<compile_context>
chip_gen: v6e
topology: v6e:2x2x1
jax: 0.10.0
libtpu: 0.0.40
codegen_flags: <defaults>
</compile_context>

<pallas_src>
import functools

import jax
import jax.numpy as jnp
from jax.experimental import pallas as pl
from jax.experimental.pallas import tpu as pltpu

F32 = jnp.float32
_MiB = 1024 * 1024

# Set to jax.lax.Precision.HIGHEST for bit-closer parity with an f32 reference;
# default MXU precision passes 1e-3 tolerances and the kernel is memory-bound.
MATMUL_PRECISION = None


# ----------------------------------------------------------------------------
# VMEM budgeting / block-size selection
# ----------------------------------------------------------------------------
def _vmem_budget_bytes():
    """Generation-aware VMEM budget (v5e/v6e: 128 MiB, v7x: 64 MiB per TC)."""
    try:
        cap = int(pltpu.get_tpu_info().vmem_capacity_bytes)
    except Exception:  # interpret mode / CPU tracing — safe-everywhere value
        cap = 64 * _MiB
    return (cap * 3) // 4


def _choose_bt(B, C, V, usable):
    """Batch elements per grid step: ~2-4 MiB x-blocks, VMEM-feasible, full
    blocks only, and (when the batch allows) >= ~8 grid steps so pipelining /
    megacore sharding have several steps per TensorCore."""
    bpb = C * V * 4                                  # bytes of one (C, V) f32 slab
    bt_vmem = max(1, usable // (4 * bpb))            # 2x double-buffered x + attended
    bt = min(B, 256, bt_vmem, max(1, (4 * _MiB) // bpb))
    # Trade block size for pipeline depth only while blocks stay >= ~1 MiB.
    while bt > 1 and (B + bt - 1) // bt < 8 and (bt // 2) * bpb >= _MiB:
        bt //= 2
    while B % bt:                                    # full blocks only
        bt -= 1
    return bt


# ----------------------------------------------------------------------------
# Fused Attention3DPool kernel: Bt batch elements per grid step.
# x block is (Bt, C, V) with V = T*H*W on the lane dimension.
# ----------------------------------------------------------------------------
def _fused_kernel(x_ref, w1_ref, b1_ref, w2t_ref, b2_ref, w3t_ref, b3_ref,
                  w4_ref, b4_ref, attended_ref, sattn_ref, cat_hid_ref,
                  *, pack_rows):
    C = x_ref.shape[1]

    # Hoist the tiny, VMEM-resident weights out of the per-batch loop.
    w1 = w1_ref[...]       # (Cr, C)
    b1 = b1_ref[...]       # (Cr, 1)
    w2t = w2t_ref[...]     # (Cr, 1)
    b2 = b2_ref[...]       # (1, 1)
    w3t = w3t_ref[...]     # (C, Cr)
    b3 = b3_ref[...]       # (1, Cr)
    w4 = w4_ref[...]       # (C, Cr)
    b4 = b4_ref[...]       # (C, 1)

    if pack_rows:
        # Identity mask used for the tiny (C,1)->(1,C) relayout (VPU multiply
        # + sublane reduce; avoids relying on narrow-transpose lowering).
        eye = (jax.lax.broadcasted_iota(jnp.int32, (C, C), 0) ==
               jax.lax.broadcasted_iota(jnp.int32, (C, C), 1)).astype(F32)

        def col_to_row(col):                       # (C, 1) -> (1, C)
            return jnp.sum(col * eye, axis=0, keepdims=True)

    def body(bt, carry):
        x = x_ref[bt]                                                    # (C, V)

        # -- spatial attention: conv1x1 -> ReLU -> conv1x1 -> sigmoid --------
        s1 = jnp.dot(w1, x, preferred_element_type=F32,
                     precision=MATMUL_PRECISION) + b1                    # (Cr, V)  MXU
        s1 = jnp.maximum(s1, 0.0)
        # (1,Cr)@(Cr,V) as a VPU multiply + sublane reduce (no degenerate MXU push).
        sattn = jax.nn.sigmoid(
            jnp.sum(s1 * w2t, axis=0, keepdims=True) + b2)               # (1, V)

        # -- channel attention: GAP -> conv1x1 -> ReLU -> conv1x1 -> sigmoid -
        # All contractions are tiny -> VPU/XLU only.
        gap = jnp.mean(x, axis=1, keepdims=True)                         # (C, 1)
        c1 = jnp.maximum(jnp.sum(w3t * gap, axis=0, keepdims=True) + b3, 0.0)  # (1, Cr)
        cattn = jax.nn.sigmoid(jnp.sum(w4 * c1, axis=1, keepdims=True) + b4)   # (C, 1)

        # -- attend + global average pool ------------------------------------
        # `att` feeds both the store and the mean: single (C, V) temporary,
        # no extra VMEM materialisation (keeps the v5e vst slot for attended).
        att = x * sattn * cattn                                          # (C, V)
        attended_ref[bt] = att.astype(attended_ref.dtype)
        sattn_ref[bt] = sattn
        hidden = jnp.mean(att, axis=1, keepdims=True)                    # (C, 1)

        if pack_rows:
            cat_hid_ref[bt] = jnp.concatenate(
                [col_to_row(cattn), col_to_row(hidden)], axis=0)         # (2, C) lane-dense
        else:
            cat_hid_ref[bt] = jnp.concatenate([cattn, hidden], axis=1)   # (C, 2)
        return carry

    n_b = x_ref.shape[0]
    jax.lax.fori_loop(0, n_b, body, 0, unroll=min(n_b, 8))


# ----------------------------------------------------------------------------
# Fallback for shapes where one (C, T*H*W) slab does not fit VMEM:
# phase 1 (tiny, pure JAX) computes the channel attention from the GAP;
# phase 2 is a V-tiled Pallas kernel for the spatial branch, the attended
# product and the pooled output (accumulated across V tiles).
# ----------------------------------------------------------------------------
def _attention3d_pool_vtiled(x_f, p, B, C, T, H, W, V, Cr, budget, attended_dtype):
    # TODO(synk): phase 1 re-reads x from HBM once; a fused two-pass grid could
    # share that read but doubles kernel complexity for a rare shape regime.
    gap = jnp.mean(x_f, axis=2)                                          # (B, C)
    c1 = jax.nn.relu(gap @ p['w3'].T + p['b3'][None, :])                 # (B, Cr)
    cattn = jax.nn.sigmoid(c1 @ p['w4'].T + p['b4'][None, :])            # (B, C)

    usable = budget - 16 * _MiB
    vt = min(int(usable * 0.8) // (16 * C), (4 * _MiB) // (4 * C))
    vt = max(128, (vt // 128) * 128)                 # lane-aligned V tile
    n_v = pl.cdiv(V, vt)
    vpad = n_v * vt
    if vpad != V:
        # Zero-pad so padded positions contribute exactly 0 to the pooled sum.
        x_f = jnp.pad(x_f, ((0, 0), (0, 0), (0, vpad - V)))
    inv_v = 1.0 / float(V)

    def kernel(x_ref, cattn_ref, w1_ref, b1_ref, w2t_ref, b2_ref,
               attended_ref, sattn_ref, hidden_ref):
        x = x_ref[0]                                                     # (C, vt)
        s1 = jnp.maximum(
            jnp.dot(w1_ref[...], x, preferred_element_type=F32,
                    precision=MATMUL_PRECISION) + b1_ref[...], 0.0)      # (Cr, vt)
        sattn = jax.nn.sigmoid(
            jnp.sum(s1 * w2t_ref[...], axis=0, keepdims=True) + b2_ref[...])  # (1, vt)
        att = x * sattn * cattn_ref[0]
        attended_ref[0] = att.astype(attended_ref.dtype)
        sattn_ref[0] = sattn

        @pl.when(pl.program_id(1) == 0)
        def _():
            hidden_ref[0] = jnp.zeros_like(hidden_ref[0])
        hidden_ref[0] += jnp.sum(att, axis=1, keepdims=True) * inv_v

    attended, sattn, hidden = pl.pallas_call(
        kernel,
        out_shape=(
            jax.ShapeDtypeStruct((B, C, vpad), attended_dtype),
            jax.ShapeDtypeStruct((B, 1, vpad), F32),
            jax.ShapeDtypeStruct((B, C, 1), F32),
        ),
        grid=(B, n_v),
        in_specs=[
            pl.BlockSpec((1, C, vt), lambda b, v: (b, 0, v)),
            pl.BlockSpec((1, C, 1), lambda b, v: (b, 0, 0)),
            pl.BlockSpec((Cr, C), lambda b, v: (0, 0)),
            pl.BlockSpec((Cr, 1), lambda b, v: (0, 0)),
            pl.BlockSpec((Cr, 1), lambda b, v: (0, 0)),
            pl.BlockSpec((1, 1), lambda b, v: (0, 0)),
        ],
        out_specs=(
            pl.BlockSpec((1, C, vt), lambda b, v: (b, 0, v)),
            pl.BlockSpec((1, 1, vt), lambda b, v: (b, 0, v)),
            pl.BlockSpec((1, C, 1), lambda b, v: (b, 0, 0)),   # resident across v
        ),
        compiler_params=pltpu.CompilerParams(
            dimension_semantics=("parallel", "arbitrary"),
            vmem_limit_bytes=int(max(32 * _MiB,
                                     min(budget, 16 * C * vt + 16 * _MiB))),
        ),
    )(
        x_f, cattn.reshape(B, C, 1),
        p['w1'], p['b1'].reshape(Cr, 1),
        p['w2'].reshape(Cr, 1), p['b2'].reshape(1, 1),
    )

    if vpad != V:
        attended = attended[:, :, :V]
        sattn = sattn[:, :, :V]
    return {
        'hidden': hidden.reshape(B, C),
        'spatial_attention': sattn.reshape(B, T, H, W),
        'channel_attention': cattn,
        'attended': attended.reshape(B, C, T, H, W),
    }


# ----------------------------------------------------------------------------
# Public wrapper
# ----------------------------------------------------------------------------
def attention3d_pool(x, p, *, attended_dtype=F32):
    """x: (B, C, T, H, W) float32; p: dict of squeezed 1x1x1-conv weights/biases.

    `attended_dtype` may be set to jnp.bfloat16 to halve the dominant HBM
    writeback (compute stays f32); default keeps f32 parity with PyTorch.
    """
    B, C, T, H, W = x.shape
    V = T * H * W
    Cr = p['w1'].shape[0]
    x_f = x.reshape(B, C, V)          # metadata-only reshape (channels-first)

    budget = _vmem_budget_bytes()
    usable = budget - 16 * _MiB
    slab_bytes = C * V * 4

    if 4 * slab_bytes > usable:
        # A single (C, T*H*W) slab (double-buffered in + out) does not fit
        # VMEM on this generation -> V-tiled two-phase path.
        return _attention3d_pool_vtiled(x_f, p, B, C, T, H, W, V, Cr,
                                        budget, attended_dtype)

    bt = _choose_bt(B, C, V, usable)
    n_steps = B // bt

    pack_rows = C <= 256              # lane-dense (2, C) rows vs (C, 2) columns
    cat_hid_shape = (B, 2, C) if pack_rows else (B, C, 2)
    cat_hid_block = (bt, 2, C) if pack_rows else (bt, C, 2)

    # VMEM limit from actual block bytes (double-buffered) + headroom.
    step_bytes = bt * (2 * slab_bytes + V * 4 + 2 * C * 4)
    vmem_limit = int(max(32 * _MiB, min(budget, 2 * step_bytes + 16 * _MiB)))

    cost = pl.CostEstimate(
        flops=int(2 * B * Cr * C * V + 2 * B * Cr * V + 4 * B * C * V),
        transcendentals=int(B * (V + C)),
        bytes_accessed=int(4 * (2 * B * C * V + B * V + 2 * B * C)),
    )

    kernel = functools.partial(_fused_kernel, pack_rows=pack_rows)

    attended, sattn, cat_hid = pl.pallas_call(
        kernel,
        out_shape=(
            jax.ShapeDtypeStruct((B, C, V), attended_dtype),   # attended
            jax.ShapeDtypeStruct((B, 1, V), F32),              # spatial attention
            jax.ShapeDtypeStruct(cat_hid_shape, F32),          # cattn + hidden packed
        ),
        grid=(n_steps,),
        in_specs=[
            pl.BlockSpec((bt, C, V), lambda b: (b, 0, 0)),
            # Tiny weights: constant index maps -> VMEM resident across steps.
            pl.BlockSpec((Cr, C), lambda b: (0, 0)),
            pl.BlockSpec((Cr, 1), lambda b: (0, 0)),
            pl.BlockSpec((Cr, 1), lambda b: (0, 0)),
            pl.BlockSpec((1, 1), lambda b: (0, 0)),
            pl.BlockSpec((C, Cr), lambda b: (0, 0)),
            pl.BlockSpec((1, Cr), lambda b: (0, 0)),
            pl.BlockSpec((C, Cr), lambda b: (0, 0)),
            pl.BlockSpec((C, 1), lambda b: (0, 0)),
        ],
        out_specs=(
            pl.BlockSpec((bt, C, V), lambda b: (b, 0, 0)),
            pl.BlockSpec((bt, 1, V), lambda b: (b, 0, 0)),
            pl.BlockSpec(cat_hid_block, lambda b: (b, 0, 0)),
        ),
        compiler_params=pltpu.CompilerParams(
            dimension_semantics=("parallel",),     # batch steps shard over v7x TCs
            vmem_limit_bytes=vmem_limit,
        ),
        cost_estimate=cost,
    )(
        x_f,
        p['w1'], p['b1'].reshape(Cr, 1),
        p['w2'].reshape(Cr, 1), p['b2'].reshape(1, 1),
        p['w3'].T, p['b3'].reshape(1, Cr),
        p['w4'], p['b4'].reshape(C, 1),
    )

    if pack_rows:
        cattn_out, hidden_out = cat_hid[:, 0, :], cat_hid[:, 1, :]
    else:
        cattn_out, hidden_out = cat_hid[:, :, 0], cat_hid[:, :, 1]

    return {
        'hidden': hidden_out,
        'spatial_attention': sattn.reshape(B, T, H, W),
        'channel_attention': cattn_out,
        'attended': attended.reshape(B, C, T, H, W),
    }


# ----------------------------------------------------------------------------
# Pure-JAX reference (mirrors the PyTorch module) for correctness checking.
# ----------------------------------------------------------------------------
def attention3d_pool_reference(x, p):
    hp = jax.lax.Precision.HIGHEST
    s1 = jax.nn.relu(jnp.einsum('rc,bcthw->brthw', p['w1'], x, precision=hp)
                     + p['b1'][None, :, None, None, None])
    sattn = jax.nn.sigmoid(jnp.einsum('or,brthw->bothw', p['w2'], s1, precision=hp)
                           + p['b2'][None, :, None, None, None])        # (B,1,T,H,W)
    gap = jnp.mean(x, axis=(2, 3, 4))                                   # (B, C)
    c1 = jax.nn.relu(jnp.einsum('rc,bc->br', p['w3'], gap, precision=hp)
                     + p['b3'][None, :])
    cattn = jax.nn.sigmoid(jnp.einsum('cr,br->bc', p['w4'], c1, precision=hp)
                           + p['b4'][None, :])                          # (B, C)
    attended = x * sattn * cattn[:, :, None, None, None]
    hidden = jnp.mean(attended, axis=(2, 3, 4))
    return {
        'hidden': hidden,
        'spatial_attention': sattn[:, 0],
        'channel_attention': cattn,
        'attended': attended,
    }


# ----------------------------------------------------------------------------
# Deterministic synthetic parameters.
# NOTE: PyTorch Conv3d(k=1) weights are (Cout, Cin, 1, 1, 1); stored here
#       squeezed to (Cout, Cin).
# ----------------------------------------------------------------------------
def make_params(key, num_chan, reduction_ratio=8):
    cr = num_chan // reduction_ratio
    ks = jax.random.split(key, 8)

    def w(k, shape, fan_in):
        return jax.random.normal(k, shape, F32) / jnp.sqrt(jnp.asarray(fan_in, F32))

    return {
        'w1': w(ks[0], (cr, num_chan), num_chan),
        'b1': 0.05 * jax.random.normal(ks[1], (cr,), F32),
        'w2': w(ks[2], (1, cr), cr),
        'b2': 0.05 * jax.random.normal(ks[3], (1,), F32),
        'w3': w(ks[4], (cr, num_chan), num_chan),
        'b3': 0.05 * jax.random.normal(ks[5], (cr,), F32),
        'w4': w(ks[6], (num_chan, cr), cr),
        'b4': 0.05 * jax.random.normal(ks[7], (num_chan,), F32),
    }


if __name__ == "__main__":
    B, C, T, H, W = 2, 64, 4, 8, 8        # small shapes; T*H*W = 256 (lane-dense)
    R = 8                                  # reduction_ratio -> Cr = 8

    key = jax.random.PRNGKey(0)
    kx, kp = jax.random.split(key)
    x = jax.random.normal(kx, (B, C, T, H, W), F32)
    params = make_params(kp, C, R)

    out = attention3d_pool(x, params)
    jax.tree_util.tree_map(jax.block_until_ready, out)

    # shape checks (match the PyTorch module's return dict)
    assert out['hidden'].shape == (B, C)
    assert out['spatial_attention'].shape == (B, T, H, W)
    assert out['channel_attention'].shape == (B, C)
    assert out['attended'].shape == (B, C, T, H, W)

    # numerical check against the pure-JAX reference
    ref = attention3d_pool_reference(x, params)
    for name in ('hidden', 'spatial_attention', 'channel_attention', 'attended'):
        ok = bool(jnp.allclose(out[name], ref[name], rtol=1e-3, atol=1e-3))
        assert ok, (f"mismatch in {name}: max abs err "
                    f"{float(jnp.max(jnp.abs(out[name] - ref[name])))}")

    print("KERNEL_OK")
</pallas_src>

<mosaic_0001>
module attributes {stable_mosaic.version = 11 : i64} {
  func.func @_fused_kernel(%arg0: i32, %arg1: memref<2x64x256xf32, #tpu.memory_space<vmem>>, %arg2: memref<8x64xf32, #tpu.memory_space<vmem>>, %arg3: memref<8x1xf32, #tpu.memory_space<vmem>>, %arg4: memref<8x1xf32, #tpu.memory_space<vmem>>, %arg5: memref<1x1xf32, #tpu.memory_space<vmem>>, %arg6: memref<64x8xf32, #tpu.memory_space<vmem>>, %arg7: memref<1x8xf32, #tpu.memory_space<vmem>>, %arg8: memref<64x8xf32, #tpu.memory_space<vmem>>, %arg9: memref<64x1xf32, #tpu.memory_space<vmem>>, %arg10: memref<2x64x256xf32, #tpu.memory_space<vmem>>, %arg11: memref<2x1x256xf32, #tpu.memory_space<vmem>>, %arg12: memref<2x2x64xf32, #tpu.memory_space<vmem>>) attributes {dimension_semantics = [#tpu.dimension_semantics<parallel>], iteration_bounds = array<i64: 1>, scalar_prefetch = 0 : i64, scratch_operands = 0 : i64, tpu.core_type = #tpu.core_type<tc>, window_params = [{transform_indices = @transform_0, window_bounds = array<i64: 2, 64, 256>}, {pipeline_mode = #tpu.pipeline_mode<synchronous>, transform_indices = @transform_1, window_bounds = array<i64: 8, 64>}, {pipeline_mode = #tpu.pipeline_mode<synchronous>, transform_indices = @transform_2, window_bounds = array<i64: 8, 1>}, {pipeline_mode = #tpu.pipeline_mode<synchronous>, transform_indices = @transform_3, window_bounds = array<i64: 8, 1>}, {pipeline_mode = #tpu.pipeline_mode<synchronous>, transform_indices = @transform_4, window_bounds = array<i64: 1, 1>}, {pipeline_mode = #tpu.pipeline_mode<synchronous>, transform_indices = @transform_5, window_bounds = array<i64: 64, 8>}, {pipeline_mode = #tpu.pipeline_mode<synchronous>, transform_indices = @transform_6, window_bounds = array<i64: 1, 8>}, {pipeline_mode = #tpu.pipeline_mode<synchronous>, transform_indices = @transform_7, window_bounds = array<i64: 64, 8>}, {pipeline_mode = #tpu.pipeline_mode<synchronous>, transform_indices = @transform_8, window_bounds = array<i64: 64, 1>}, {transform_indices = @transform_9, window_bounds = array<i64: 2, 64, 256>}, {transform_indices = @transform_10, window_bounds = array<i64: 2, 1, 256>}, {transform_indices = @transform_11, window_bounds = array<i64: 2, 2, 64>}]} {
    %c0 = arith.constant 0 : index
    %c0_0 = arith.constant 0 : index
    %0 = vector.load %arg2[%c0, %c0_0] : memref<8x64xf32, #tpu.memory_space<vmem>>, vector<8x64xf32>
    %c0_1 = arith.constant 0 : index
    %c0_2 = arith.constant 0 : index
    %1 = vector.load %arg3[%c0_1, %c0_2] : memref<8x1xf32, #tpu.memory_space<vmem>>, vector<8x1xf32>
    %c0_3 = arith.constant 0 : index
    %c0_4 = arith.constant 0 : index
    %2 = vector.load %arg4[%c0_3, %c0_4] : memref<8x1xf32, #tpu.memory_space<vmem>>, vector<8x1xf32>
    %c0_5 = arith.constant 0 : index
    %c0_6 = arith.constant 0 : index
    %3 = vector.load %arg5[%c0_5, %c0_6] : memref<1x1xf32, #tpu.memory_space<vmem>>, vector<1x1xf32>
    %c0_7 = arith.constant 0 : index
    %c0_8 = arith.constant 0 : index
    %4 = vector.load %arg6[%c0_7, %c0_8] : memref<64x8xf32, #tpu.memory_space<vmem>>, vector<64x8xf32>
    %c0_9 = arith.constant 0 : index
    %c0_10 = arith.constant 0 : index
    %5 = vector.load %arg7[%c0_9, %c0_10] : memref<1x8xf32, #tpu.memory_space<vmem>>, vector<1x8xf32>
    %c0_11 = arith.constant 0 : index
    %c0_12 = arith.constant 0 : index
    %6 = vector.load %arg8[%c0_11, %c0_12] : memref<64x8xf32, #tpu.memory_space<vmem>>, vector<64x8xf32>
    %c0_13 = arith.constant 0 : index
    %c0_14 = arith.constant 0 : index
    %7 = vector.load %arg9[%c0_13, %c0_14] : memref<64x1xf32, #tpu.memory_space<vmem>>, vector<64x1xf32>
    %8 = tpu.iota {dimensions = array<i32: 0>} : vector<64x64xi32>
    %9 = tpu.iota {dimensions = array<i32: 1>} : vector<64x64xi32>
    %10 = arith.cmpi eq, %8, %9 : vector<64x64xi32>
    %11 = arith.extui %10 : vector<64x64xi1> to vector<64x64xi32>
    %12 = arith.sitofp %11 : vector<64x64xi32> to vector<64x64xf32>
    %c0_i32 = arith.constant 0 : i32
    %13 = arith.index_cast %c0_i32 : i32 to index
    %c0_15 = arith.constant 0 : index
    %c0_16 = arith.constant 0 : index
    %14 = vector.load %arg1[%13, %c0_15, %c0_16] : memref<2x64x256xf32, #tpu.memory_space<vmem>>, vector<1x64x256xf32>
    %15 = vector.shape_cast %14 : vector<1x64x256xf32> to vector<64x256xf32>
    %cst = arith.constant dense<0.000000e+00> : vector<8x256xf32>
    %16 = tpu.matmul %0, %15, %cst {dimension_numbers = #tpu.dot_dimension_numbers<[1], [0], [0], [1], [0, 0, 1, 1], [], []>} : vector<8x64xf32>, vector<64x256xf32>, vector<8x256xf32> -> vector<8x256xf32>
    %17 = vector.broadcast %1 : vector<8x1xf32> to vector<8x256xf32>
    %18 = arith.addf %16, %17 : vector<8x256xf32>
    %cst_17 = arith.constant 0.000000e+00 : f32
    %19 = vector.broadcast %cst_17 : f32 to vector<8x256xf32>
    %20 = arith.maximumf %18, %19 : vector<8x256xf32>
    %21 = vector.broadcast %2 : vector<8x1xf32> to vector<8x256xf32>
    %22 = arith.mulf %20, %21 : vector<8x256xf32>
    %cst_18 = arith.constant dense<0.000000e+00> : vector<256xf32>
    %23 = vector.multi_reduction <add>, %22, %cst_18 [0] : vector<8x256xf32> to vector<256xf32>
    %24 = vector.shape_cast %23 : vector<256xf32> to vector<1x256xf32>
    %25 = vector.broadcast %3 : vector<1x1xf32> to vector<1x256xf32>
    %26 = arith.addf %24, %25 : vector<1x256xf32>
    %27 = arith.negf %26 : vector<1x256xf32>
    %28 = math.exp %27 : vector<1x256xf32>
    %cst_19 = arith.constant 1.000000e+00 : f32
    %29 = vector.broadcast %cst_19 : f32 to vector<1x256xf32>
    %30 = arith.addf %29, %28 : vector<1x256xf32>
    %31 = arith.divf %29, %30 : vector<1x256xf32>
    %cst_20 = arith.constant dense<0.000000e+00> : vector<64xf32>
    %32 = vector.multi_reduction <add>, %15, %cst_20 [1] : vector<64x256xf32> to vector<64xf32>
    %33 = vector.shape_cast %32 : vector<64xf32> to vector<64x1xf32>
    %cst_21 = arith.constant 2.560000e+02 : f32
    %34 = vector.broadcast %cst_21 : f32 to vector<64x1xf32>
    %35 = arith.divf %33, %34 : vector<64x1xf32>
    %36 = vector.broadcast %35 : vector<64x1xf32> to vector<64x8xf32>
    %37 = arith.mulf %4, %36 : vector<64x8xf32>
    %cst_22 = arith.constant dense<0.000000e+00> : vector<8xf32>
    %38 = vector.multi_reduction <add>, %37, %cst_22 [0] : vector<64x8xf32> to vector<8xf32>
    %39 = vector.shape_cast %38 : vector<8xf32> to vector<1x8xf32>
    %40 = arith.addf %39, %5 : vector<1x8xf32>
    %cst_23 = arith.constant 0.000000e+00 : f32
    %41 = vector.broadcast %cst_23 : f32 to vector<1x8xf32>
    %42 = arith.maximumf %40, %41 : vector<1x8xf32>
    %43 = vector.broadcast %42 : vector<1x8xf32> to vector<64x8xf32>
    %44 = arith.mulf %6, %43 : vector<64x8xf32>
    %cst_24 = arith.constant dense<0.000000e+00> : vector<64xf32>
    %45 = vector.multi_reduction <add>, %44, %cst_24 [1] : vector<64x8xf32> to vector<64xf32>
    %46 = vector.shape_cast %45 : vector<64xf32> to vector<64x1xf32>
    %47 = arith.addf %46, %7 : vector<64x1xf32>
    %48 = arith.negf %47 : vector<64x1xf32>
    %49 = math.exp %48 : vector<64x1xf32>
    %cst_25 = arith.constant 1.000000e+00 : f32
    %50 = vector.broadcast %cst_25 : f32 to vector<64x1xf32>
    %51 = arith.addf %50, %49 : vector<64x1xf32>
    %52 = arith.divf %50, %51 : vector<64x1xf32>
    %53 = vector.broadcast %31 : vector<1x256xf32> to vector<64x256xf32>
    %54 = arith.mulf %15, %53 : vector<64x256xf32>
    %55 = vector.broadcast %52 : vector<64x1xf32> to vector<64x256xf32>
    %56 = arith.mulf %54, %55 : vector<64x256xf32>
    %57 = arith.index_cast %c0_i32 : i32 to index
    %c0_26 = arith.constant 0 : index
    %c0_27 = arith.constant 0 : index
    %58 = vector.load %arg10[%57, %c0_26, %c0_27] : memref<2x64x256xf32, #tpu.memory_space<vmem>>, vector<1x64x256xf32>
    %59 = vector.shape_cast %58 : vector<1x64x256xf32> to vector<64x256xf32>
    %60 = vector.shape_cast %56 : vector<64x256xf32> to vector<1x64x256xf32>
    tpu.vector_store %arg10[%57, %c0_26, %c0_27], %60 {strides = array<i32>} : memref<2x64x256xf32, #tpu.memory_space<vmem>>, vector<1x64x256xf32>,
    %61 = arith.index_cast %c0_i32 : i32 to index
    %c0_28 = arith.constant 0 : index
    %c0_29 = arith.constant 0 : index
    %62 = vector.load %arg11[%61, %c0_28, %c0_29] : memref<2x1x256xf32, #tpu.memory_space<vmem>>, vector<1x1x256xf32>
    %63 = vector.shape_cast %62 : vector<1x1x256xf32> to vector<1x256xf32>
    %64 = vector.shape_cast %31 : vector<1x256xf32> to vector<1x1x256xf32>
    tpu.vector_store %arg11[%61, %c0_28, %c0_29], %64 {strides = array<i32>} : memref<2x1x256xf32, #tpu.memory_space<vmem>>, vector<1x1x256xf32>,
    %cst_30 = arith.constant dense<0.000000e+00> : vector<64xf32>
    %65 = vector.multi_reduction <add>, %56, %cst_30 [1] : vector<64x256xf32> to vector<64xf32>
    %66 = vector.shape_cast %65 : vector<64xf32> to vector<64x1xf32>
    %cst_31 = arith.constant 2.560000e+02 : f32
    %67 = vector.broadcast %cst_31 : f32 to vector<64x1xf32>
    %68 = arith.divf %66, %67 : vector<64x1xf32>
    %69 = vector.broadcast %52 : vector<64x1xf32> to vector<64x64xf32>
    %70 = arith.mulf %69, %12 : vector<64x64xf32>
    %cst_32 = arith.constant dense<0.000000e+00> : vector<64xf32>
    %71 = vector.multi_reduction <add>, %70, %cst_32 [0] : vector<64x64xf32> to vector<64xf32>
    %72 = vector.shape_cast %71 : vector<64xf32> to vector<1x64xf32>
    %73 = vector.broadcast %68 : vector<64x1xf32> to vector<64x64xf32>
    %74 = arith.mulf %73, %12 : vector<64x64xf32>
    %cst_33 = arith.constant dense<0.000000e+00> : vector<64xf32>
    %75 = vector.multi_reduction <add>, %74, %cst_33 [0] : vector<64x64xf32> to vector<64xf32>
    %76 = vector.shape_cast %75 : vector<64xf32> to vector<1x64xf32>
    %77 = tpu.concatenate %72, %76 in 0 : vector<1x64xf32>, vector<1x64xf32> -> vector<2x64xf32>
    %78 = arith.index_cast %c0_i32 : i32 to index
    %c0_34 = arith.constant 0 : index
    %c0_35 = arith.constant 0 : index
    %79 = vector.load %arg12[%78, %c0_34, %c0_35] : memref<2x2x64xf32, #tpu.memory_space<vmem>>, vector<1x2x64xf32>
    %80 = vector.shape_cast %79 : vector<1x2x64xf32> to vector<2x64xf32>
    %81 = vector.shape_cast %77 : vector<2x64xf32> to vector<1x2x64xf32>
    tpu.vector_store %arg12[%78, %c0_34, %c0_35], %81 {strides = array<i32>} : memref<2x2x64xf32, #tpu.memory_space<vmem>>, vector<1x2x64xf32>,
    %c1_i32 = arith.constant 1 : i32
    %82 = arith.index_cast %c1_i32 : i32 to index
    %c0_36 = arith.constant 0 : index
    %c0_37 = arith.constant 0 : index
    %83 = vector.load %arg1[%82, %c0_36, %c0_37] : memref<2x64x256xf32, #tpu.memory_space<vmem>>, vector<1x64x256xf32>
    %84 = vector.shape_cast %83 : vector<1x64x256xf32> to vector<64x256xf32>
    %cst_38 = arith.constant dense<0.000000e+00> : vector<8x256xf32>
    %85 = tpu.matmul %0, %84, %cst_38 {dimension_numbers = #tpu.dot_dimension_numbers<[1], [0], [0], [1], [0, 0, 1, 1], [], []>} : vector<8x64xf32>, vector<64x256xf32>, vector<8x256xf32> -> vector<8x256xf32>
    %86 = vector.broadcast %1 : vector<8x1xf32> to vector<8x256xf32>
    %87 = arith.addf %85, %86 : vector<8x256xf32>
    %cst_39 = arith.constant 0.000000e+00 : f32
    %88 = vector.broadcast %cst_39 : f32 to vector<8x256xf32>
    %89 = arith.maximumf %87, %88 : vector<8x256xf32>
    %90 = vector.broadcast %2 : vector<8x1xf32> to vector<8x256xf32>
    %91 = arith.mulf %89, %90 : vector<8x256xf32>
    %cst_40 = arith.constant dense<0.000000e+00> : vector<256xf32>
    %92 = vector.multi_reduction <add>, %91, %cst_40 [0] : vector<8x256xf32> to vector<256xf32>
    %93 = vector.shape_cast %92 : vector<256xf32> to vector<1x256xf32>
    %94 = vector.broadcast %3 : vector<1x1xf32> to vector<1x256xf32>
    %95 = arith.addf %93, %94 : vector<1x256xf32>
    %96 = arith.negf %95 : vector<1x256xf32>
    %97 = math.exp %96 : vector<1x256xf32>
    %cst_41 = arith.constant 1.000000e+00 : f32
    %98 = vector.broadcast %cst_41 : f32 to vector<1x256xf32>
    %99 = arith.addf %98, %97 : vector<1x256xf32>
    %100 = arith.divf %98, %99 : vector<1x256xf32>
    %cst_42 = arith.constant dense<0.000000e+00> : vector<64xf32>
    %101 = vector.multi_reduction <add>, %84, %cst_42 [1] : vector<64x256xf32> to vector<64xf32>
    %102 = vector.shape_cast %101 : vector<64xf32> to vector<64x1xf32>
    %cst_43 = arith.constant 2.560000e+02 : f32
    %103 = vector.broadcast %cst_43 : f32 to vector<64x1xf32>
    %104 = arith.divf %102, %103 : vector<64x1xf32>
    %105 = vector.broadcast %104 : vector<64x1xf32> to vector<64x8xf32>
    %106 = arith.mulf %4, %105 : vector<64x8xf32>
    %cst_44 = arith.constant dense<0.000000e+00> : vector<8xf32>
    %107 = vector.multi_reduction <add>, %106, %cst_44 [0] : vector<64x8xf32> to vector<8xf32>
    %108 = vector.shape_cast %107 : vector<8xf32> to vector<1x8xf32>
    %109 = arith.addf %108, %5 : vector<1x8xf32>
    %cst_45 = arith.constant 0.000000e+00 : f32
    %110 = vector.broadcast %cst_45 : f32 to vector<1x8xf32>
    %111 = arith.maximumf %109, %110 : vector<1x8xf32>
    %112 = vector.broadcast %111 : vector<1x8xf32> to vector<64x8xf32>
    %113 = arith.mulf %6, %112 : vector<64x8xf32>
    %cst_46 = arith.constant dense<0.000000e+00> : vector<64xf32>
    %114 = vector.multi_reduction <add>, %113, %cst_46 [1] : vector<64x8xf32> to vector<64xf32>
    %115 = vector.shape_cast %114 : vector<64xf32> to vector<64x1xf32>
    %116 = arith.addf %115, %7 : vector<64x1xf32>
    %117 = arith.negf %116 : vector<64x1xf32>
    %118 = math.exp %117 : vector<64x1xf32>
    %cst_47 = arith.constant 1.000000e+00 : f32
    %119 = vector.broadcast %cst_47 : f32 to vector<64x1xf32>
    %120 = arith.addf %119, %118 : vector<64x1xf32>
    %121 = arith.divf %119, %120 : vector<64x1xf32>
    %122 = vector.broadcast %100 : vector<1x256xf32> to vector<64x256xf32>
    %123 = arith.mulf %84, %122 : vector<64x256xf32>
    %124 = vector.broadcast %121 : vector<64x1xf32> to vector<64x256xf32>
    %125 = arith.mulf %123, %124 : vector<64x256xf32>
    %126 = arith.index_cast %c1_i32 : i32 to index
    %c0_48 = arith.constant 0 : index
    %c0_49 = arith.constant 0 : index
    %127 = vector.load %arg10[%126, %c0_48, %c0_49] : memref<2x64x256xf32, #tpu.memory_space<vmem>>, vector<1x64x256xf32>
    %128 = vector.shape_cast %127 : vector<1x64x256xf32> to vector<64x256xf32>
    %129 = vector.shape_cast %125 : vector<64x256xf32> to vector<1x64x256xf32>
    tpu.vector_store %arg10[%126, %c0_48, %c0_49], %129 {strides = array<i32>} : memref<2x64x256xf32, #tpu.memory_space<vmem>>, vector<1x64x256xf32>,
    %130 = arith.index_cast %c1_i32 : i32 to index
    %c0_50 = arith.constant 0 : index
    %c0_51 = arith.constant 0 : index
    %131 = vector.load %arg11[%130, %c0_50, %c0_51] : memref<2x1x256xf32, #tpu.memory_space<vmem>>, vector<1x1x256xf32>
    %132 = vector.shape_cast %131 : vector<1x1x256xf32> to vector<1x256xf32>
    %133 = vector.shape_cast %100 : vector<1x256xf32> to vector<1x1x256xf32>
    tpu.vector_store %arg11[%130, %c0_50, %c0_51], %133 {strides = array<i32>} : memref<2x1x256xf32, #tpu.memory_space<vmem>>, vector<1x1x256xf32>,
    %cst_52 = arith.constant dense<0.000000e+00> : vector<64xf32>
    %134 = vector.multi_reduction <add>, %125, %cst_52 [1] : vector<64x256xf32> to vector<64xf32>
    %135 = vector.shape_cast %134 : vector<64xf32> to vector<64x1xf32>
    %cst_53 = arith.constant 2.560000e+02 : f32
    %136 = vector.broadcast %cst_53 : f32 to vector<64x1xf32>
    %137 = arith.divf %135, %136 : vector<64x1xf32>
    %138 = vector.broadcast %121 : vector<64x1xf32> to vector<64x64xf32>
    %139 = arith.mulf %138, %12 : vector<64x64xf32>
    %cst_54 = arith.constant dense<0.000000e+00> : vector<64xf32>
    %140 = vector.multi_reduction <add>, %139, %cst_54 [0] : vector<64x64xf32> to vector<64xf32>
    %141 = vector.shape_cast %140 : vector<64xf32> to vector<1x64xf32>
    %142 = vector.broadcast %137 : vector<64x1xf32> to vector<64x64xf32>
    %143 = arith.mulf %142, %12 : vector<64x64xf32>
    %cst_55 = arith.constant dense<0.000000e+00> : vector<64xf32>
    %144 = vector.multi_reduction <add>, %143, %cst_55 [0] : vector<64x64xf32> to vector<64xf32>
    %145 = vector.shape_cast %144 : vector<64xf32> to vector<1x64xf32>
    %146 = tpu.concatenate %141, %145 in 0 : vector<1x64xf32>, vector<1x64xf32> -> vector<2x64xf32>
    %147 = arith.index_cast %c1_i32 : i32 to index
    %c0_56 = arith.constant 0 : index
    %c0_57 = arith.constant 0 : index
    %148 = vector.load %arg12[%147, %c0_56, %c0_57] : memref<2x2x64xf32, #tpu.memory_space<vmem>>, vector<1x2x64xf32>
    %149 = vector.shape_cast %148 : vector<1x2x64xf32> to vector<2x64xf32>
    %150 = vector.shape_cast %146 : vector<2x64xf32> to vector<1x2x64xf32>
    tpu.vector_store %arg12[%147, %c0_56, %c0_57], %150 {strides = array<i32>} : memref<2x2x64xf32, #tpu.memory_space<vmem>>, vector<1x2x64xf32>,
    %c2_i32 = arith.constant 2 : i32
    return
  }
  func.func @transform_0(%arg0: i32) -> (i32, i32, i32) {
    %c0_i32 = arith.constant 0 : i32
    %c0_i32_0 = arith.constant 0 : i32
    %c0_i32_1 = arith.constant 0 : i32
    return %arg0, %c0_i32, %c0_i32_0 : i32, i32, i32
  }
  func.func @transform_1(%arg0: i32) -> (i32, i32) {
    %c0_i32 = arith.constant 0 : i32
    %c0_i32_0 = arith.constant 0 : i32
    %c0_i32_1 = arith.constant 0 : i32
    return %c0_i32, %c0_i32_0 : i32, i32
  }
  func.func @transform_2(%arg0: i32) -> (i32, i32) {
    %c0_i32 = arith.constant 0 : i32
    %c0_i32_0 = arith.constant 0 : i32
    %c0_i32_1 = arith.constant 0 : i32
    return %c0_i32, %c0_i32_0 : i32, i32
  }
  func.func @transform_3(%arg0: i32) -> (i32, i32) {
    %c0_i32 = arith.constant 0 : i32
    %c0_i32_0 = arith.constant 0 : i32
    %c0_i32_1 = arith.constant 0 : i32
    return %c0_i32, %c0_i32_0 : i32, i32
  }
  func.func @transform_4(%arg0: i32) -> (i32, i32) {
    %c0_i32 = arith.constant 0 : i32
    %c0_i32_0 = arith.constant 0 : i32
    %c0_i32_1 = arith.constant 0 : i32
    return %c0_i32, %c0_i32_0 : i32, i32
  }
  func.func @transform_5(%arg0: i32) -> (i32, i32) {
    %c0_i32 = arith.constant 0 : i32
    %c0_i32_0 = arith.constant 0 : i32
    %c0_i32_1 = arith.constant 0 : i32
    return %c0_i32, %c0_i32_0 : i32, i32
  }
  func.func @transform_6(%arg0: i32) -> (i32, i32) {
    %c0_i32 = arith.constant 0 : i32
    %c0_i32_0 = arith.constant 0 : i32
    %c0_i32_1 = arith.constant 0 : i32
    return %c0_i32, %c0_i32_0 : i32, i32
  }
  func.func @transform_7(%arg0: i32) -> (i32, i32) {
    %c0_i32 = arith.constant 0 : i32
    %c0_i32_0 = arith.constant 0 : i32
    %c0_i32_1 = arith.constant 0 : i32
    return %c0_i32, %c0_i32_0 : i32, i32
  }
  func.func @transform_8(%arg0: i32) -> (i32, i32) {
    %c0_i32 = arith.constant 0 : i32
    %c0_i32_0 = arith.constant 0 : i32
    %c0_i32_1 = arith.constant 0 : i32
    return %c0_i32, %c0_i32_0 : i32, i32
  }
  func.func @transform_9(%arg0: i32) -> (i32, i32, i32) {
    %c0_i32 = arith.constant 0 : i32
    %c0_i32_0 = arith.constant 0 : i32
    %c0_i32_1 = arith.constant 0 : i32
    return %arg0, %c0_i32, %c0_i32_0 : i32, i32, i32
  }
  func.func @transform_10(%arg0: i32) -> (i32, i32, i32) {
    %c0_i32 = arith.constant 0 : i32
    %c0_i32_0 = arith.constant 0 : i32
    %c0_i32_1 = arith.constant 0 : i32
    return %arg0, %c0_i32, %c0_i32_0 : i32, i32, i32
  }
  func.func @transform_11(%arg0: i32) -> (i32, i32, i32) {
    %c0_i32 = arith.constant 0 : i32
    %c0_i32_0 = arith.constant 0 : i32
    %c0_i32_1 = arith.constant 0 : i32
    return %arg0, %c0_i32, %c0_i32_0 : i32, i32, i32
  }
}

</mosaic_0001>

<bundles_post_ra>
// kernel: tpu_custom_call.1
= control target key start
LH: loop header
LB: loop body
LE: loop exit
PB: predicated region body
PF: predicated region fallthrough
CT: control target
= control target key end

     0   :  { %s1827_s0 = inlined_call_operand.hbm [shape: f32[2,64,256], index: 0, kind: input, shape index: {}]   ;;  %s1828_s1 = inlined_call_operand.vmem [shape: f32[8,64], index: 1, kind: input, shape index: {}]   ;;  %s1829_s2 = inlined_call_operand.vmem [shape: f32[8,1], index: 2, kind: input, shape index: {}]   ;;  %s1830_s3 = inlined_call_operand.vmem [shape: f32[8,1], index: 3, kind: input, shape index: {}]   ;;  %s1831_s4 = inlined_call_operand.<no memory space> [shape: f32[1,1], index: 4, kind: input, shape index: {}]   ;;  %s1832_s5 = inlined_call_operand.vmem [shape: f32[64,8], index: 5, kind: input, shape index: {}]   ;;  %s1833_s6 = inlined_call_operand.vmem [shape: f32[1,8], index: 6, kind: input, shape index: {}]   ;;  %s1834_s7 = inlined_call_operand.vmem [shape: f32[64,8], index: 7, kind: input, shape index: {}]   ;;  %s1835_s8 = inlined_call_operand.vmem [shape: f32[64,1], index: 8, kind: input, shape index: {}]   ;;  %s1836_s9 = inlined_call_operand.hbm [shape: f32[2,64,256], index: 9, kind: output, shape index: {0}]   ;;  %s1837_s10 = inlined_call_operand.hbm [shape: f32[2,1,256], index: 10, kind: output, shape index: {1}]   ;;  %s1838_s11 = inlined_call_operand.hbm [shape: f32[2,2,64], index: 11, kind: output, shape index: {2}]  }
   0x1   :  { %v17_v0 = vstv %s1831_s4 }
   0x2   :  { %18 = vst [vmem:[#allocation2] sm:$0x1] %v17_v0 }
   0x3   :  { %19 = vsyncpa [#allocation4], 0 }
   0x4   :  { %20 = vsyncpa [#allocation5], 0 }
   0x5   :  { %21 = vsyncpa [#allocation8], 0  ;;  %s1383_s19 = smov [#allocation3]  }
   0x6   :  { %s27_s20 = sshll.u32 %s1383_s19, 4  ;;  %s28_s20 = int_to_ptr.vmem [resolvable:$true] %s27_s20 }
   0x7   :  { %s1305_s21 = scalar_lea.vmem %s28_s20, 4096  ;;  %p1310_p1 = scmp.lt.s32.totalorder %s28_s20, %s28_s20 }
   0x8   :  { %p1306_p0 = scmp.ne.s32.totalorder %s28_s20, %s1305_s21  ;;  %p1311_p2 = scmp.lt.s32.totalorder %s1305_s21, %s1305_s21 }
   0xa   :  { %p1312_p3 = por %p1311_p2, %p1310_p1 }
   0xc   :  { %p1313_p4 = pnand %p1312_p3, %p1306_p0 }
   0xe   :  { %1316 = shalt.err (!%p1313_p4)
}
   0xf   :  { %s1384_s22 = smov 256   ;;  %s1385_s23 = smov 16  }
  0x10   :  { %33 = dma.hbm_to_vmem [thread:$0]  %s1827_s0, 4096, %s28_s20, [#allocation4], %s1384_s22, %s1384_s22, %s1385_s23  }
  0x11   :  { %1377 = dma.done.wait [#allocation4], 4096  }
  0x12   :  { %1378 = vsyncadd [#allocation4], 4294963200  ;;  %v1463_v1 = vld [vmem:[#allocation3 + $0x80] sm:$0xff]  ;;  %v1465_v2 = vld [vmem:[#allocation3 + $0x88] sm:$0xff]  ;;  %vm138_vm0 = vcmask 523264   ;;  %v1386_v50 = vmov 0.0  }
  0x13   :  { %v1467_v3 = vld [vmem:[#allocation3] sm:$0xff]  ;;  %v737_v4 = vadd.f32 %v1465_v2, %v1463_v1  ;;  %v1471_v5 = vld [vmem:[#allocation3 + $0x8] sm:$0xff]  ;;  %v1473_v6 = vld [vmem:[#allocation3 + $0x90] sm:$0xff]  ;;  %206 = vmatprep.mubr.f32.mxu0 %v1386_v50  ;;  %700 = vmatprep.mubr.f32.mxu1 %v1386_v50  ;;  %v1387_v51 = vmov 0   ;;  %vm298_vm1 = vcmask 64512  }
  0x14   :  { %v1475_v7 = vld [vmem:[#allocation3 + $0x98] sm:$0xff]  ;;  %v257_v8 = vadd.f32 %v1471_v5, %v1467_v3  ;;  %v1479_v9 = vld [vmem:[#allocation3 + $0x10] sm:$0xff]  ;;  %v1487_v13 = vld [vmem:[#allocation3 + $0xa0] sm:$0xff]  ;;  %1183 = vset.pattern.permute.xlu0 %v1387_v51  ;;  %1184 = vset.pattern.permute.xlu1 %v1387_v51 }
  0x15   :  { %v1481_v10 = vld [vmem:[#allocation3 + $0x18] sm:$0xff]  ;;  %738 = vadd.xlane.f32.xlu1 %v737_v4  ;;  %v740_v11 = vadd.f32 %v1475_v7, %v1473_v6  ;;  %v1489_v14 = vld [vmem:[#allocation3 + $0xa8] sm:$0xff]  ;;  %v1491_v15 = vld [vmem:[#allocation3 + $0x20] sm:$0xff] }
  0x16   :  { %258 = vadd.xlane.f32.xlu0 %v257_v8  ;;  %v260_v12 = vadd.f32 %v1481_v10, %v1479_v9  ;;  %v122_v16 = vld [vmem:[#allocation3 + $0x28] sm:$0xff]  ;;  %v743_v17 = vadd.f32 %v1489_v14, %v1487_v13  ;;  %v626_v19 = vld [vmem:[#allocation3 + $0xb0] sm:$0xff]  ;;  %v627_v20 = vld [vmem:[#allocation3 + $0xb8] sm:$0xff] }
  0x17   :  { %v263_v18 = vadd.f32 %v122_v16, %v1491_v15  ;;  %v123_v21 = vld [vmem:[#allocation3 + $0x30] sm:$0xff]  ;;  %v124_v22 = vld [vmem:[#allocation3 + $0x38] sm:$0xff]  ;;  %v746_v25 = vadd.f32 %v627_v20, %v626_v19  ;;  %v628_v26 = vld [vmem:[#allocation3 + $0xc0] sm:$0xff] }
  0x18   :  { %v635_v23 = vld [vmem:[#allocation3 + $0xf8] sm:$0xff]  ;;  %v629_v27 = vld [vmem:[#allocation3 + $0xc8] sm:$0xff]  ;;  %v131_v28 = vld [vmem:[#allocation3 + $0x70] sm:$0xff]  ;;  %v266_v29 = vadd.f32 %v124_v22, %v123_v21 }
  0x19   :  { %741 = vadd.xlane.f32.xlu1 %v740_v11  ;;  %v132_v24 = vld [vmem:[#allocation3 + $0x78] sm:$0xff]  ;;  %652 = vmatprep.subr.mxu1 %v635_v23  ;;  %v125_v30 = vld [vmem:[#allocation3 + $0x40] sm:$0xff]  ;;  %v130_v31 = vld [vmem:[#allocation3 + $0x68] sm:$0xff]  ;;  %v749_v37 = vadd.f32 %v629_v27, %v628_v26 }
  0x1a   :  { %261 = vadd.xlane.f32.xlu0 %v260_v12  ;;  %158 = vmatprep.subr.mxu0 %v132_v24  ;;  %v634_v32 = vld [vmem:[#allocation3 + $0xf0] sm:$0xff]  ;;  %v126_v33 = vld [vmem:[#allocation3 + $0x48] sm:$0xff]  ;;  %v129_v35 = vld [vmem:[#allocation3 + $0x60] sm:$0xff]  ;;  %v278_v48 = vadd.f32 %v132_v24, %v131_v28 }
  0x1b   :  { %159 = vmatpush1.msra.mxu0 %v131_v28  ;;  %v633_v34 = vld [vmem:[#allocation3 + $0xe8] sm:$0xff]  ;;  %653 = vmatpush1.msra.mxu1 %v634_v32  ;;  %v632_v36 = vld [vmem:[#allocation3 + $0xe0] sm:$0xff]  ;;  %v128_v38 = vld [vmem:[#allocation3 + $0x58] sm:$0xff]  ;;  %v269_v39 = vadd.f32 %v126_v33, %v125_v30  ;;  %v275_v46 = vadd.f32 %v130_v31, %v129_v35  ;;  %v758_v47 = vadd.f32 %v635_v23, %v634_v32 }
  0x1c   :  { %160 = vmatprep.subr.mxu0 %v130_v31  ;;  %654 = vmatprep.subr.mxu1 %v633_v34  ;;  %v630_v40 = vld [vmem:[#allocation3 + $0xd0] sm:$0xff]  ;;  %v631_v41 = vld [vmem:[#allocation3 + $0xd8] sm:$0xff]  ;;  %v755_v45 = vadd.f32 %v633_v34, %v632_v36  ;;  %v58_v61 = vld [vmem:[%s1832_s5 + $0x8] sm:$0xff] }
  0x1d   :  { %744 = vadd.xlane.f32.xlu1 %v743_v17  ;;  %161 = vmatpush1.msra.mxu0 %v129_v35  ;;  %v127_v42 = vld [vmem:[#allocation3 + $0x50] sm:$0xff]  ;;  %v752_v43 = vadd.f32 %v631_v41, %v630_v40  ;;  %v53_v49 = vld [vmem:[%s1828_s1] sm:$0xff] }
  0x1e   :  { %264 = vadd.xlane.f32.xlu0 %v263_v18  ;;  %655 = vmatpush1.msra.mxu1 %v632_v36  ;;  %v272_v44 = vadd.f32 %v128_v38, %v127_v42  ;;  %v57_v60 = vld [vmem:[%s1832_s5] sm:$0xff]  ;;  %v60_v12 = vld [vmem:[%s1832_s5 + $0x18] sm:$0xff] }
  0x1f   :  { %162 = vmatprep.subr.mxu0 %v128_v38  ;;  %656 = vmatprep.subr.mxu1 %v631_v41 }
  0x20   :  { %163 = vmatpush1.msra.mxu0 %v127_v42  ;;  %657 = vmatpush1.msra.mxu1 %v630_v40  ;;  %v63_v42 = vld [vmem:[%s1832_s5 + $0x30] sm:$0xff] }
  0x21   :  { %747 = vadd.xlane.f32.xlu1 %v746_v25  ;;  %164 = vmatprep.subr.mxu0 %v126_v33 }
  0x22   :  { %267 = vadd.xlane.f32.xlu0 %v266_v29  ;;  %658 = vmatprep.subr.mxu1 %v629_v27  ;;  %v62_v27 = vld [vmem:[%s1832_s5 + $0x28] sm:$0xff] }
  0x23   :  { %165 = vmatpush1.msra.mxu0 %v125_v30  ;;  %659 = vmatpush1.msra.mxu1 %v628_v26 }
  0x24   :  { %166 = vmatprep.subr.mxu0 %v124_v22  ;;  %660 = vmatprep.subr.mxu1 %v627_v20  ;;  %v61_v20 = vld [vmem:[%s1832_s5 + $0x20] sm:$0xff] }
  0x25   :  { %750 = vadd.xlane.f32.xlu1 %v749_v37  ;;  %167 = vmatpush1.msra.mxu0 %v123_v21 }
  0x26   :  { %270 = vadd.xlane.f32.xlu0 %v269_v39  ;;  %661 = vmatpush1.msra.mxu1 %v626_v19 }
  0x27   :  { %168 = vmatprep.subr.mxu0 %v122_v16  ;;  %662 = vmatprep.subr.mxu1 %v1489_v14 }
  0x28   :  { %169 = vmatpush1.msra.mxu0 %v1491_v15  ;;  %663 = vmatpush1.msra.mxu1 %v1487_v13 }
  0x29   :  { %753 = vadd.xlane.f32.xlu1 %v752_v43  ;;  %170 = vmatprep.subr.mxu0 %v1481_v10 }
  0x2a   :  { %273 = vadd.xlane.f32.xlu0 %v272_v44  ;;  %664 = vmatprep.subr.mxu1 %v1475_v7 }
  0x2b   :  { %171 = vmatpush1.msra.mxu0 %v1479_v9  ;;  %665 = vmatpush1.msra.mxu1 %v1473_v6 }
  0x2c   :  { %172 = vmatprep.subr.mxu0 %v1471_v5  ;;  %666 = vmatprep.subr.mxu1 %v1465_v2  ;;  %v59_v5 = vld [vmem:[%s1832_s5 + $0x10] sm:$0xff] }
  0x2d   :  { %756 = vadd.xlane.f32.xlu1 %v755_v45  ;;  %173 = vmatpush1.msra.mxu0 %v1467_v3 }
  0x2e   :  { %276 = vadd.xlane.f32.xlu0 %v275_v46  ;;  %667 = vmatpush1.msra.mxu1 %v1463_v1 }
  0x2f   :  { %1150 = vmatmul.mubr.msk.f32.vlgmr.msra.gmra.mxu0 %vm138_vm0, %v53_v49  ;;  %1161 = vmatmul.mubr.msk.f32.vlgmr.msra.gmra.mxu1 %vm138_vm0, %v53_v49 }
  0x31   :  { %759 = vadd.xlane.f32.xlu1 %v758_v47 }
  0x32   :  { %279 = vadd.xlane.f32.xlu0 %v278_v48 }
  0x9e   :  { %v739_v52 = vpop.xlane.xlu1 %738 }
  0x9f   :  { %v259_v53 = vpop.xlane.xlu0 %258  ;;  %v761_v56 = vmul.f32 0.00390625, %v739_v52 }
  0xa0   :  { %v282_v3 = vmul.f32 0.00390625, %v259_v53 }
  0xa1   :  { %v769_v62 = vmul.f32 %v761_v56, %v57_v60 }
  0xa2   :  { %v742_v54 = vpop.xlane.xlu1 %741  ;;  %v290_v15 = vmul.f32 %v282_v3, %v57_v60 }
  0xa3   :  { %v262_v55 = vpop.xlane.xlu0 %261  ;;  %v762_v57 = vmul.f32 0.00390625, %v742_v54  ;;  %v777_v7 = vsel %vm298_vm1, %v769_v62, 0.0 }
  0xa4   :  { %v283_v1 = vmul.f32 0.00390625, %v262_v55  ;;  %v299_v28 = vsel %vm298_vm1, %v290_v15, 0.0 }
  0xa5   :  { %v770_v63 = vmul.f32 %v762_v57, %v58_v61 }
  0xa6   :  { %v745_v58 = vpop.xlane.xlu1 %744  ;;  %v291_v11 = vmul.f32 %v283_v1, %v58_v61 }
  0xa7   :  { %v265_v59 = vpop.xlane.xlu0 %264  ;;  %v763_v0 = vmul.f32 0.00390625, %v745_v58  ;;  %v778_v8 = vsel %vm298_vm1, %v770_v63, 0.0  ;;  %v64_v58 = vld [vmem:[%s1832_s5 + $0x38] sm:$0xff] }
  0xa8   :  { %v284_v6 = vmul.f32 0.00390625, %v265_v59  ;;  %v779_v18 = vadd.f32 %v778_v8, %v777_v7  ;;  %v300_v24 = vsel %vm298_vm1, %v291_v11, 0.0 }
  0xa9   :  { %v771_v9 = vmul.f32 %v763_v0, %v59_v5  ;;  %v301_v36 = vadd.f32 %v300_v24, %v299_v28 }
  0xaa   :  { %v748_v2 = vpop.xlane.xlu1 %747  ;;  %v292_v19 = vmul.f32 %v284_v6, %v59_v5 }
  0xab   :  { %v268_v4 = vpop.xlane.xlu0 %267  ;;  %v764_v10 = vmul.f32 0.00390625, %v748_v2  ;;  %v780_v22 = vsel %vm298_vm1, %v771_v9, 0.0 }
  0xac   :  { %v285_v13 = vmul.f32 0.00390625, %v268_v4  ;;  %v781_v32 = vadd.f32 %v780_v22, %v779_v18  ;;  %v302_v33 = vsel %vm298_vm1, %v292_v19, 0.0  ;;  %v65_v22 = vld [vmem:[%s1833_s6] sm:$0x1] }
  0xad   :  { %v772_v23 = vmul.f32 %v764_v10, %v60_v12  ;;  %v303_v43 = vadd.f32 %v302_v33, %v301_v36 }
  0xae   :  { %v751_v14 = vpop.xlane.xlu1 %750  ;;  %v293_v25 = vmul.f32 %v285_v13, %v60_v12 }
  0xaf   :  { %v765_v16 = vmul.f32 0.00390625, %v751_v14  ;;  %v271_v17 = vpop.xlane.xlu0 %270  ;;  %v782_v37 = vsel %vm298_vm1, %v772_v23, 0.0 }
  0xb0   :  { %v286_v21 = vmul.f32 0.00390625, %v271_v17  ;;  %v304_v39 = vsel %vm298_vm1, %v293_v25, 0.0  ;;  %v783_v47 = vadd.f32 %v782_v37, %v781_v32  ;;  %v66_v32 = vld [vmem:[%s1834_s7] sm:$0xff] }
  0xb1   :  { %v773_v29 = vmul.f32 %v765_v16, %v61_v20  ;;  %v305_v51 = vadd.f32 %v304_v39, %v303_v43  ;;  %v82_v16 = vlaneseq }
  0xb2   :  { %v754_v26 = vpop.xlane.xlu1 %753  ;;  %v294_v34 = vmul.f32 %v286_v21, %v61_v20 }
  0xb3   :  { %v766_v30 = vmul.f32 0.00390625, %v754_v26  ;;  %v274_v31 = vpop.xlane.xlu0 %273  ;;  %v784_v44 = vsel %vm298_vm1, %v773_v29, 0.0  ;;  %v1555_v21 = vshrl.u32 %v82_v16, 7  ;;  %vm522_vm2 = vcmp.lt.s32.totalorder %v82_v16, 256 }
  0xb4   :  { %v287_v35 = vmul.f32 0.00390625, %v274_v31  ;;  %v306_v48 = vsel %vm298_vm1, %v294_v34, 0.0  ;;  %v785_v54 = vadd.f32 %v784_v44, %v783_v47  ;;  %v67_v31 = vld [vmem:[%s1834_s7 + $0x8] sm:$0xff] }
  0xb5   :  { %v774_v38 = vmul.f32 %v766_v30, %v62_v27  ;;  %v307_v59 = vadd.f32 %v306_v48, %v305_v51 }
  0xb6   :  { %v295_v40 = vmul.f32 %v287_v35, %v62_v27  ;;  %v757_v41 = vpop.xlane.xlu1 %756  ;;  %v1561_v27 = vsub.s32 0, %v1555_v21 }
  0xb7   :  { %v767_v45 = vmul.f32 0.00390625, %v757_v41  ;;  %v277_v46 = vpop.xlane.xlu0 %276  ;;  %v786_v52 = vsel %vm298_vm1, %v774_v38, 0.0  ;;  %v68_v41 = vld [vmem:[%s1834_s7 + $0x10] sm:$0xff] }
  0xb8   :  { %v288_v49 = vmul.f32 0.00390625, %v277_v46  ;;  %v308_v55 = vsel %vm298_vm1, %v295_v40, 0.0  ;;  %v787_v63 = vadd.f32 %v786_v52, %v785_v54  ;;  %v69_v46 = vld [vmem:[%s1834_s7 + $0x18] sm:$0xff]  ;;  %v70_v52 = vld [vmem:[%s1834_s7 + $0x20] sm:$0xff] }
  0xb9   :  { %v775_v53 = vmul.f32 %v767_v45, %v63_v42  ;;  %v309_v2 = vadd.f32 %v308_v55, %v307_v59 }
  0xba   :  { %v296_v56 = vmul.f32 %v288_v49, %v63_v42  ;;  %v760_v57 = vpop.xlane.xlu1 %759 }
  0xbb   :  { %v788_v60 = vsel %vm298_vm1, %v775_v53, 0.0  ;;  %v768_v61 = vmul.f32 0.00390625, %v760_v57  ;;  %v280_v62 = vpop.xlane.xlu0 %279  ;;  %v71_v57 = vld [vmem:[%s1834_s7 + $0x28] sm:$0xff] }
  0xbc   :  { %v310_v0 = vsel %vm298_vm1, %v296_v56, 0.0  ;;  %v289_v1 = vmul.f32 0.00390625, %v280_v62  ;;  %v789_v4 = vadd.f32 %v788_v60, %v787_v63  ;;  %v72_v62 = vld [vmem:[%s1834_s7 + $0x30] sm:$0xff] }
  0xbd   :  { %v776_v3 = vmul.f32 %v768_v61, %v64_v58  ;;  %v311_v6 = vadd.f32 %v310_v0, %v309_v2 }
  0xbe   :  { %v297_v5 = vmul.f32 %v289_v1, %v64_v58 }
  0xbf   :  { %v790_v7 = vsel %vm298_vm1, %v776_v3, 0.0  ;;  %v73_v3 = vld [vmem:[%s1834_s7 + $0x38] sm:$0xff] }
  0xc0   :  { %v791_v8 = vadd.f32 %v790_v7, %v789_v4  ;;  %v312_v9 = vsel %vm298_vm1, %v297_v5, 0.0 }
  0xc1   :  { %v313_v10 = vadd.f32 %v312_v9, %v311_v6 }
  0xc2   :  { %v792_v11 = vrot.slane %v791_v8, 4 }
  0xc3   :  { %v314_v12 = vrot.slane %v313_v10, 4 }
  0xc4   :  { %v793_v13 = vadd.f32 %v792_v11, %v791_v8  ;;  %v56_v11 = vld [vmem:[#allocation2] sm:$0x1] }
  0xc5   :  { %v315_v14 = vadd.f32 %v314_v12, %v313_v10  ;;  %v55_v10 = vld [vmem:[%s1830_s3] sm:$0xff] }
  0xc6   :  { %v794_v15 = vrot.slane %v793_v13, 2  ;;  %v54_v12 = vld [vmem:[%s1829_s2] sm:$0xff] }
  0xc7   :  { %v316_v17 = vrot.slane %v315_v14, 2 }
  0xc8   :  { %v795_v18 = vadd.f32 %v794_v15, %v793_v13  ;;  %v75_v13 = vld [vmem:[%s1835_s8 + $0x8] sm:$0xff] }
  0xc9   :  { %v317_v19 = vadd.f32 %v316_v17, %v315_v14  ;;  %v74_v14 = vld [vmem:[%s1835_s8] sm:$0xff] }
  0xca   :  { %v796_v20 = vrot.slane %v795_v18, 1 }
  0xcb   :  { %v318_v23 = vrot.slane %v317_v19, 1 }
  0xcc   :  { %v797_v24 = vadd.f32 %v796_v20, %v795_v18 }
  0xcd   :  { %v319_v25 = vadd.f32 %v318_v23, %v317_v19 }
  0xce   :  { %v798_v26 = vadd.f32 %v797_v24, %v65_v22 }
  0xcf   :  { %v320_v28 = vadd.f32 %v319_v25, %v65_v22 }
  0xd0   :  { %v799_v29 = vmax.f32 %v798_v26, 0.0 }
  0xd1   :  { %v321_v30 = vmax.f32 %v320_v28, 0.0  ;;  %v76_v28 = vld [vmem:[%s1835_s8 + $0x10] sm:$0xff] }
  0xd2   :  { %v803_v33 = vrot.slane %v799_v29, %v1561_v27 }
  0xd3   :  { %v325_v34 = vrot.slane %v321_v30, %v1561_v27 }
  0xd4   :  { %v805_v39 = vmul.f32 %v803_v33, %v67_v31  ;;  %v804_v40 = vmul.f32 %v803_v33, %v66_v32  ;;  %v806_v44 = vmul.f32 %v803_v33, %v68_v41  ;;  %v807_v49 = vmul.f32 %v803_v33, %v69_v46 }
  0xd5   :  { %v327_v35 = vmul.f32 %v325_v34, %v67_v31  ;;  %v326_v36 = vmul.f32 %v325_v34, %v66_v32  ;;  %v328_v45 = vmul.f32 %v325_v34, %v68_v41  ;;  %v329_v51 = vmul.f32 %v325_v34, %v69_v46 }
  0xd6   :  { %v815_v42 = vsel %vm298_vm1, %v805_v39, 0.0  ;;  %v812_v43 = vsel %vm298_vm1, %v804_v40, 0.0  ;;  %v818_v47 = vsel %vm298_vm1, %v806_v44, 0.0  ;;  %v821_v53 = vsel %vm298_vm1, %v807_v49, 0.0  ;;  %v78_v40 = vld [vmem:[%s1835_s8 + $0x20] sm:$0xff] }
  0xd7   :  { %v337_v37 = vsel %vm298_vm1, %v327_v35, 0.0  ;;  %v334_v38 = vsel %vm298_vm1, %v326_v36, 0.0  ;;  %v340_v48 = vsel %vm298_vm1, %v328_v45, 0.0  ;;  %v343_v54 = vsel %vm298_vm1, %v329_v51, 0.0 }
  0xd8   :  { %338 = vadd.xlane.f32.xlu1 %v337_v37  ;;  %335 = vadd.xlane.f32.xlu0 %v334_v38  ;;  %v808_v55 = vmul.f32 %v803_v33, %v70_v52  ;;  %v330_v56 = vmul.f32 %v325_v34, %v70_v52  ;;  %v809_v60 = vmul.f32 %v803_v33, %v71_v57 }
  0xd9   :  { %v331_v61 = vmul.f32 %v325_v34, %v71_v57  ;;  %v810_v1 = vmul.f32 %v803_v33, %v72_v62  ;;  %v332_v2 = vmul.f32 %v325_v34, %v72_v62  ;;  %v811_v6 = vmul.f32 %v803_v33, %v73_v3 }
  0xda   :  { %v824_v58 = vsel %vm298_vm1, %v808_v55, 0.0  ;;  %v346_v59 = vsel %vm298_vm1, %v330_v56, 0.0  ;;  %v827_v63 = vsel %vm298_vm1, %v809_v60, 0.0  ;;  %v333_v7 = vmul.f32 %v325_v34, %v73_v3  ;;  %v77_v34 = vld [vmem:[%s1835_s8 + $0x18] sm:$0xff] }
  0xdb   :  { %v349_v0 = vsel %vm298_vm1, %v331_v61, 0.0  ;;  %v830_v4 = vsel %vm298_vm1, %v810_v1, 0.0  ;;  %v352_v5 = vsel %vm298_vm1, %v332_v2, 0.0  ;;  %v833_v8 = vsel %vm298_vm1, %v811_v6, 0.0 }
  0xdc   :  { %816 = vadd.xlane.f32.xlu1 %v815_v42  ;;  %813 = vadd.xlane.f32.xlu0 %v812_v43  ;;  %v355_v9 = vsel %vm298_vm1, %v333_v7, 0.0 }
  0xe0   :  { %819 = vadd.xlane.f32.xlu1 %v818_v47  ;;  %341 = vadd.xlane.f32.xlu0 %v340_v48  ;;  %v79_v48 = vld [vmem:[%s1835_s8 + $0x28] sm:$0xff] }
  0xe4   :  { %822 = vadd.xlane.f32.xlu1 %v821_v53  ;;  %344 = vadd.xlane.f32.xlu0 %v343_v54 }
  0xe8   :  { %825 = vadd.xlane.f32.xlu1 %v824_v58  ;;  %347 = vadd.xlane.f32.xlu0 %v346_v59  ;;  %v80_v59 = vld [vmem:[%s1835_s8 + $0x30] sm:$0xff] }
  0xec   :  { %828 = vadd.xlane.f32.xlu1 %v827_v63  ;;  %350 = vadd.xlane.f32.xlu0 %v349_v0 }
  0xf0   :  { %831 = vadd.xlane.f32.xlu1 %v830_v4  ;;  %353 = vadd.xlane.f32.xlu0 %v352_v5  ;;  %v81_v5 = vld [vmem:[%s1835_s8 + $0x38] sm:$0xff]  ;;  %s1389_s8 = smov [#allocation7]  }
  0xf1   :  { %s1111_s13 = sshll.u32 %s1389_s8, 4  ;;  %s1112_s13 = int_to_ptr.vmem [resolvable:$true] %s1111_s13 }
  0xf2   :  { %s1317_s14 = scalar_lea.vmem %s1112_s13, 64  ;;  %p1322_p6 = scmp.lt.s32.totalorder %s1112_s13, %s1112_s13 }
  0xf3   :  { %p1318_p5 = scmp.ne.s32.totalorder %s1112_s13, %s1317_s14  ;;  %p1323_p7 = scmp.lt.s32.totalorder %s1317_s14, %s1317_s14 }
  0xf4   :  { %834 = vadd.xlane.f32.xlu1 %v833_v8  ;;  %356 = vadd.xlane.f32.xlu0 %v355_v9 }
  0xf5   :  { %p1324_p8 = por %p1323_p7, %p1322_p6 }
  0xf7   :  { %p1325_p9 = pnand %p1324_p8, %p1318_p5 }
 0x105   :  { %217 = vperm.xlu1 %1184, %v55_v10  }
 0x109   :  { %236 = vperm.xlu1 %1184, %v56_v11  }
 0x10a   :  { %135 = vperm.xlu0 %1183, %v54_v12  }
 0x161   :  { %v339_v15 = vpop.xlane.xlu1 %338  ;;  %v336_v17 = vpop.xlane.xlu0 %335 }
 0x162   :  { %v359_v18 = vadd.f32 %v339_v15, %v75_v13  ;;  %v358_v19 = vadd.f32 %v336_v17, %v74_v14  ;;  %v208_v15 = vpop.f32.mrf.mxu0 }
 0x164   :  { %v1154_v20 = vmul.f32 -1.442695, %v359_v18  ;;  %v1153_v22 = vmul.f32 -1.442695, %v358_v19  ;;  %v702_v19 = vpop.f32.mrf.mxu1 }
 0x165   :  { %v817_v23 = vpop.xlane.xlu1 %816  ;;  %v814_v24 = vpop.xlane.xlu0 %813 }
 0x166   :  { %1185 = vpow2.f32 %v1154_v20  ;;  %v837_v25 = vadd.f32 %v817_v23, %v75_v13  ;;  %v836_v26 = vadd.f32 %v814_v24, %v74_v14 }
 0x167   :  { %1187 = vpow2.f32 %v1153_v22 }
 0x168   :  { %v1165_v29 = vmul.f32 -1.442695, %v837_v25  ;;  %v1164_v30 = vmul.f32 -1.442695, %v836_v26  ;;  %v210_v26 = vpop.f32.mrf.mxu0 }
 0x169   :  { %v820_v31 = vpop.xlane.xlu1 %819  ;;  %v342_v32 = vpop.xlane.xlu0 %341 }
 0x16a   :  { %v360_v33 = vadd.f32 %v342_v32, %v76_v28  ;;  %1189 = vpow2.f32 %v1164_v30  ;;  %v838_v38 = vadd.f32 %v820_v31, %v76_v28 }
 0x16b   :  { %1191 = vpow2.f32 %v1165_v29  ;;  %v704_v29 = vpop.f32.mrf.mxu1 }
 0x16c   :  { %v1155_v35 = vmul.f32 -1.442695, %v360_v33  ;;  %v1166_v44 = vmul.f32 -1.442695, %v838_v38 }
 0x16d   :  { %v823_v36 = vpop.xlane.xlu1 %822  ;;  %v345_v37 = vpop.xlane.xlu0 %344 }
 0x16e   :  { %v361_v39 = vadd.f32 %v345_v37, %v77_v34  ;;  %1193 = vpow2.f32 %v1155_v35  ;;  %v839_v45 = vadd.f32 %v823_v36, %v77_v34 }
 0x170   :  { %v1156_v41 = vmul.f32 -1.442695, %v361_v39  ;;  %v1167_v55 = vmul.f32 -1.442695, %v839_v45 }
 0x171   :  { %v826_v42 = vpop.xlane.xlu1 %825  ;;  %v348_v43 = vpop.xlane.xlu0 %347 }
 0x172   :  { %v362_v46 = vadd.f32 %v348_v43, %v78_v40  ;;  %1195 = vpow2.f32 %v1156_v41  ;;  %v840_v56 = vadd.f32 %v826_v42, %v78_v40 }
 0x173   :  { %v1186_v47 = vpop.eup %1185  ;;  %1197 = vpow2.f32 %v1166_v44 }
 0x174   :  { %v1188_v49 = vpop.eup %1187  ;;  %v1157_v52 = vmul.f32 -1.442695, %v362_v46  ;;  %v391_v58 = vadd.f32 1.0, %v1186_v47  ;;  %v1168_v1 = vmul.f32 -1.442695, %v840_v56 }
 0x175   :  { %v390_v51 = vadd.f32 1.0, %v1188_v49  ;;  %v829_v53 = vpop.xlane.xlu1 %828  ;;  %v351_v54 = vpop.xlane.xlu0 %350 }
 0x176   :  { %v363_v57 = vadd.f32 %v351_v54, %v79_v48  ;;  %v841_v2 = vadd.f32 %v829_v53, %v79_v48 }
 0x177   :  { %1199 = vrcp.f32 %v390_v51  ;;  %v1190_v60 = vpop.eup %1189 }
 0x178   :  { %v1192_v61 = vpop.eup %1191  ;;  %1201 = vpow2.f32 %v1157_v52  ;;  %v1158_v62 = vmul.f32 -1.442695, %v363_v57  ;;  %v868_v4 = vadd.f32 1.0, %v1190_v60  ;;  %v1169_v11 = vmul.f32 -1.442695, %v841_v2 }
 0x179   :  { %v832_v63 = vpop.xlane.xlu1 %831  ;;  %v354_v0 = vpop.xlane.xlu0 %353  ;;  %1203 = vpow2.f32 %v1167_v55  ;;  %v869_v6 = vadd.f32 1.0, %v1192_v61 }
 0x17a   :  { %v364_v3 = vadd.f32 %v354_v0, %v80_v59  ;;  %1205 = vrcp.f32 %v391_v58  ;;  %v842_v12 = vadd.f32 %v832_v63, %v80_v59 }
 0x17b   :  { %v1194_v7 = vpop.eup %1193  ;;  %1207 = vpow2.f32 %v1158_v62 }
 0x17c   :  { %v1159_v8 = vmul.f32 -1.442695, %v364_v3  ;;  %1209 = vpow2.f32 %v1168_v1  ;;  %v392_v18 = vadd.f32 1.0, %v1194_v7  ;;  %v1170_v23 = vmul.f32 -1.442695, %v842_v12 }
 0x17d   :  { %v835_v9 = vpop.xlane.xlu1 %834  ;;  %v357_v10 = vpop.xlane.xlu0 %356  ;;  %1211 = vrcp.f32 %v868_v4 }
 0x17e   :  { %v365_v13 = vadd.f32 %v357_v10, %v81_v5  ;;  %v843_v14 = vadd.f32 %v835_v9, %v81_v5  ;;  %1213 = vrcp.f32 %v869_v6 }
 0x17f   :  { %v1196_v17 = vpop.eup %1195  ;;  %1215 = vpow2.f32 %v1159_v8 }
 0x180   :  { %v393_v20 = vadd.f32 1.0, %v1196_v17  ;;  %v1160_v22 = vmul.f32 -1.442695, %v365_v13  ;;  %1217 = vpow2.f32 %v1169_v11  ;;  %v1198_v24 = vpop.eup %1197  ;;  %v1171_v25 = vmul.f32 -1.442695, %v843_v14 }
 0x181   :  { %v870_v36 = vadd.f32 1.0, %v1198_v24  ;;  %v218_v39 = vpop.permute.xlu1 %217 }
 0x182   :  { %1219 = vrcp.f32 %v393_v20 }
 0x183   :  { %1221 = vrcp.f32 %v392_v18 }
 0x184   :  { %v1200_v28 = vpop.eup %1199  ;;  %1223 = vpow2.f32 %v1160_v22 }
 0x185   :  { %432 = vperm.xlu1 %1184, %v1200_v28   ;;  %v136_v30 = vpop.permute.xlu0 %135  ;;  %v1202_v31 = vpop.eup %1201  ;;  %1225 = vpow2.f32 %v1170_v23 }
 0x186   :  { %v209_v32 = vadd.f32 %v208_v15, %v136_v30  ;;  %v703_v33 = vadd.f32 %v702_v19, %v136_v30  ;;  %v211_v34 = vadd.f32 %v210_v26, %v136_v30  ;;  %v1204_v35 = vpop.eup %1203  ;;  %v394_v37 = vadd.f32 1.0, %v1202_v31  ;;  %v237_v10 = vpop.permute.xlu1 %236 }
 0x187   :  { %1227 = vpow2.f32 %v1171_v25  ;;  %v705_v38 = vadd.f32 %v704_v29, %v136_v30  ;;  %v1206_v40 = vpop.eup %1205  ;;  %v871_v51 = vadd.f32 1.0, %v1204_v35  ;;  %v242_v25 = vrot.slane %v237_v10, %v1561_v27 }
 0x188   :  { %v213_v41 = vmax.f32 %v209_v32, 0.0  ;;  %v707_v42 = vmax.f32 %v703_v33, 0.0  ;;  %v214_v43 = vmax.f32 %v211_v34, 0.0  ;;  %1229 = vrcp.f32 %v394_v37  ;;  %v1208_v45 = vpop.eup %1207 }
 0x189   :  { %437 = vperm.xlu1 %1184, %v1206_v40   ;;  %v708_v44 = vmax.f32 %v705_v38, 0.0  ;;  %v1210_v49 = vpop.eup %1209  ;;  %1231 = vrcp.f32 %v870_v36  ;;  %v395_v52 = vadd.f32 1.0, %v1208_v45  ;;  %v1651_v10 = vand.u32 127, %v82_v16 }
 0x18a   :  { %v220_v46 = vmul.f32 %v218_v39, %v213_v41  ;;  %v221_v47 = vmul.f32 %v218_v39, %v214_v43  ;;  %v709_v48 = vmul.f32 %v707_v42, %v218_v39  ;;  %v1212_v54 = vpop.eup %1211  ;;  %v872_v1 = vadd.f32 1.0, %v1210_v49 }
 0x18b   :  { %v710_v53 = vmul.f32 %v708_v44, %v218_v39  ;;  %v1214_v58 = vpop.eup %1213  ;;  %1233 = vrcp.f32 %v395_v52  ;;  %vm93_vm3 = vcmp.eq.s32.totalorder %v1555_v21, %v1651_v10 }
 0x18c   :  { %v222_v55 = vrot.slane %v220_v46, 4  ;;  %v228_v56 = vrot.slane %v221_v47, 4  ;;  %v711_v57 = vrot.slane %v709_v48, 4  ;;  %v1216_v60 = vpop.eup %1215  ;;  %1235 = vrcp.f32 %v871_v51 }
 0x18d   :  { %910 = vperm.xlu1 %1184, %v1212_v54   ;;  %v717_v59 = vrot.slane %v710_v53, 4  ;;  %v1218_v0 = vpop.eup %1217  ;;  %v396_v2 = vadd.f32 1.0, %v1216_v60  ;;  %v1388_v60 = vmov 1966171168  }
 0x18e   :  { %v223_v61 = vadd.f32 %v222_v55, %v220_v46  ;;  %v229_v62 = vadd.f32 %v228_v56, %v221_v47  ;;  %v712_v63 = vadd.f32 %v711_v57, %v709_v48  ;;  %v873_v17 = vadd.f32 1.0, %v1218_v0 }
 0x18f   :  { %v718_v3 = vadd.f32 %v717_v59, %v710_v53  ;;  %v1220_v4 = vpop.eup %1219  ;;  %1237 = vrcp.f32 %v396_v2 }
 0x190   :  { %v224_v5 = vrot.slane %v223_v61, 2  ;;  %v230_v6 = vrot.slane %v229_v62, 2  ;;  %v713_v7 = vrot.slane %v712_v63, 2  ;;  %v1222_v8 = vpop.eup %1221  ;;  %447 = vperm.xlu0 %1183, %v1220_v4   ;;  %1239 = vrcp.f32 %v872_v1 }
 0x191   :  { %915 = vperm.xlu1 %1184, %v1214_v58   ;;  %v719_v9 = vrot.slane %v718_v3, 2  ;;  %v1224_v11 = vpop.eup %1223 }
 0x192   :  { %v225_v12 = vadd.f32 %v224_v5, %v223_v61  ;;  %v231_v13 = vadd.f32 %v230_v6, %v229_v62  ;;  %v714_v14 = vadd.f32 %v713_v7, %v712_v63  ;;  %v1226_v15 = vpop.eup %1225  ;;  %v397_v18 = vadd.f32 1.0, %v1224_v11 }
 0x193   :  { %v720_v19 = vadd.f32 %v719_v9, %v718_v3  ;;  %v874_v29 = vadd.f32 1.0, %v1226_v15  ;;  %v506_v61 = vunpack.c.l.s4 %v1388_v60  ;;  %v84_v11 = vadd.s32 8, %v1555_v21  ;;  %v1273_v60 = vld [vmem:[#allocation3 + $0x30] sm:$0xff] }
 0x194   :  { %v1228_v20 = vpop.eup %1227  ;;  %v226_v22 = vrot.slane %v225_v12, 1  ;;  %v232_v23 = vrot.slane %v231_v13, 1  ;;  %v715_v24 = vrot.slane %v714_v14, 1  ;;  %1241 = vrcp.f32 %v397_v18 }
 0x195   :  { %442 = vperm.xlu1 %1184, %v1222_v8   ;;  %v721_v26 = vrot.slane %v720_v19, 1  ;;  %v1230_v28 = vpop.eup %1229  ;;  %1243 = vrcp.f32 %v873_v17  ;;  %v875_v33 = vadd.f32 1.0, %v1228_v20  ;;  %v507_v63 = vunpack.c.0.s8 %v506_v61 }
 0x196   :  { %v227_v30 = vadd.f32 %v226_v22, %v225_v12  ;;  %v233_v31 = vadd.f32 %v232_v23, %v231_v13  ;;  %v716_v32 = vadd.f32 %v715_v24, %v714_v14  ;;  %452 = vperm.xlu0 %1183, %v1230_v28   ;;  %v1232_v35 = vpop.eup %1231  ;;  %1245 = vrcp.f32 %v874_v29  ;;  %v1265_v12 = vld [vmem:[#allocation3] sm:$0xff]  ;;  %v1266_v14 = vld [vmem:[#allocation3 + $0x8] sm:$0xff]  ;;  %v1268_v28 = vld [vmem:[#allocation3 + $0x18] sm:$0xff] }
 0x197   :  { %v722_v34 = vadd.f32 %v721_v26, %v720_v19  ;;  %1247 = vrcp.f32 %v875_v33  ;;  %v510_v3 = vsub.s32 %v507_v63, %v1555_v21  ;;  %vm94_vm4 = vcmp.eq.s32.totalorder %v84_v11, %v1651_v10  ;;  %v1274_v63 = vld [vmem:[#allocation3 + $0x38] sm:$0xff] }
 0x198   :  { %v243_v36 = vadd.f32 %v242_v25, %v227_v30  ;;  %v244_v37 = vadd.f32 %v242_v25, %v233_v31  ;;  %v723_v38 = vadd.f32 %v716_v32, %v242_v25  ;;  %v1234_v40 = vpop.eup %1233  ;;  %v1660_v17 = vsel %vm93_vm3, 1.0, %v1386_v50 }
 0x199   :  { %920 = vperm.xlu1 %1184, %v1232_v35   ;;  %v724_v39 = vadd.f32 %v722_v34, %v242_v25  ;;  %v1236_v44 = vpop.eup %1235  ;;  %v1663_v20 = vsel %vm94_vm4, 1.0, %v1386_v50  ;;  %v86_v22 = vadd.s32 24, %v1555_v21  ;;  %v1267_v25 = vld [vmem:[#allocation3 + $0x10] sm:$0xff]  ;;  %v85_v31 = vadd.s32 16, %v1555_v21 }
 0x19a   :  { %v1151_v27 = vmul.f32 -1.442695, %v243_v36  ;;  %v1152_v41 = vmul.f32 -1.442695, %v244_v37  ;;  %v1162_v42 = vmul.f32 -1.442695, %v723_v38  ;;  %457 = vperm.xlu0 %1183, %v1234_v40  }
 0x19b   :  { %v1163_v43 = vmul.f32 -1.442695, %v724_v39  ;;  %v87_v35 = vadd.s32 32, %v1555_v21  ;;  %vm96_vm5 = vcmp.eq.s32.totalorder %v86_v22, %v1651_v10  ;;  %v1269_v36 = vld [vmem:[#allocation3 + $0x80] sm:$0xff]  ;;  %v88_v38 = vadd.s32 40, %v1555_v21 }
 0x19c   :  { %1249 = vpow2.f32 %v1151_v27  ;;  %v1238_v45 = vpop.eup %1237  ;;  %v89_v39 = vadd.s32 48, %v1555_v21  ;;  %vm95_vm6 = vcmp.eq.s32.totalorder %v85_v31, %v1651_v10 }
 0x19d   :  { %925 = vperm.xlu1 %1184, %v1236_v44   ;;  %1251 = vpow2.f32 %v1152_v41  ;;  %v1240_v46 = vpop.eup %1239  ;;  %vm97_vm7 = vcmp.eq.s32.totalorder %v87_v35, %v1651_v10  ;;  %vm98_vm8 = vcmp.eq.s32.totalorder %v88_v38, %v1651_v10  ;;  %v1279_v35 = vld [vmem:[#allocation3 + $0xa8] sm:$0xff] }
 0x19e   :  { %1253 = vpow2.f32 %v1162_v42  ;;  %462 = vperm.xlu0 %1183, %v1238_v45   ;;  %v1270_v42 = vld [vmem:[#allocation3 + $0x88] sm:$0xff]  ;;  %vm99_vm9 = vcmp.eq.s32.totalorder %v89_v39, %v1651_v10  ;;  %v1281_v39 = vld [vmem:[#allocation3 + $0xb0] sm:$0xff] }
 0x19f   :  { %1255 = vpow2.f32 %v1163_v43  ;;  %v1711_v11 = vsel %vm99_vm9, 1.0, %v1386_v50 }
 0x1a1   :  { %930 = vperm.xlu1 %1184, %v1240_v46   ;;  %v1242_v47 = vpop.eup %1241 }
 0x1a2   :  { %467 = vperm.xlu0 %1183, %v1242_v47   ;;  %v1244_v48 = vpop.eup %1243 }
 0x1a3   :  { %v1246_v49 = vpop.eup %1245 }
 0x1a4   :  { %v1248_v51 = vpop.eup %1247 }
 0x1a5   :  { %935 = vperm.xlu1 %1184, %v1244_v48   ;;  %v1686_v48 = vsel %vm96_vm5, 1.0, %v1386_v50 }
 0x1a9   :  { %v1250_v52 = vpop.eup %1249  ;;  %940 = vperm.xlu1 %1184, %v1246_v49  }
 0x1aa   :  { %v1252_v53 = vpop.eup %1251  ;;  %v251_v55 = vadd.f32 1.0, %v1250_v52  ;;  %v1271_v52 = vld [vmem:[#allocation3 + $0x90] sm:$0xff] }
 0x1ab   :  { %v1254_v54 = vpop.eup %1253  ;;  %v252_v57 = vadd.f32 1.0, %v1252_v53 }
 0x1ac   :  { %v1256_v56 = vpop.eup %1255  ;;  %v731_v58 = vadd.f32 1.0, %v1254_v54  ;;  %1257 = vrcp.f32 %v251_v55  ;;  %v1272_v54 = vld [vmem:[#allocation3 + $0x98] sm:$0xff] }
 0x1ad   :  { %945 = vperm.xlu1 %1184, %v1248_v51   ;;  %v732_v59 = vadd.f32 1.0, %v1256_v56  ;;  %1259 = vrcp.f32 %v252_v57 }
 0x1ae   :  { %1261 = vrcp.f32 %v731_v58  ;;  %v1694_v58 = vsel %vm95_vm6, 1.0, %v1386_v50 }
 0x1af   :  { %1263 = vrcp.f32 %v732_v59  ;;  %v1697_v59 = vsel %vm97_vm7, 1.0, %v1386_v50 }
 0x1b9   :  { %v1636_v62 = vpop.eup %1257 }
 0x1ba   :  { %v1638_v0 = vpop.eup %1259  ;;  %v414_v13 = vmul.f32 %v1265_v12, %v1636_v62  ;;  %v416_v26 = vmul.f32 %v1267_v25, %v1636_v62  ;;  %v420_v61 = vmul.f32 %v1273_v60, %v1636_v62  ;;  %v1277_v25 = vld [vmem:[#allocation3 + $0xa0] sm:$0xff] }
 0x1bb   :  { %v1640_v1 = vpop.eup %1261  ;;  %v504_v4 = vcombine.low %v1636_v62, %v1638_v0  ;;  %v415_v15 = vmul.f32 %v1266_v14, %v1638_v0  ;;  %v417_v29 = vmul.f32 %v1268_v28, %v1638_v0  ;;  %v1278_v28 = vld [vmem:[#allocation3 + $0x40] sm:$0xff] }
 0x1bc   :  { %v1642_v2 = vpop.eup %1263  ;;  %v892_v37 = vmul.f32 %v1269_v36, %v1640_v1  ;;  %v894_v53 = vmul.f32 %v1271_v52, %v1640_v1  ;;  %v1283_v52 = vld [vmem:[#allocation3 + $0x50] sm:$0xff] }
 0x1bd   :  { %v983_v5 = vcombine.low %v1640_v1, %v1642_v2  ;;  %v511_v6 = vrot.slane %v504_v4, %v510_v3  ;;  %v893_v43 = vmul.f32 %v1270_v42, %v1642_v2  ;;  %v895_v55 = vmul.f32 %v1272_v54, %v1642_v2  ;;  %v1284_v54 = vld [vmem:[#allocation3 + $0x58] sm:$0xff] }
 0x1be   :  { %v897_v36 = vmul.f32 %v1279_v35, %v1642_v2 }
 0x1bf   :  { %v990_v7 = vrot.slane %v983_v5, %v510_v3  ;;  %v518_v8 = vrot.slane %v511_v6, %v510_v3 }
 0x1c1   :  { %v997_v9 = vrot.slane %v990_v7, %v510_v3  ;;  %524 = vst.msk [vmem:[#allocation7] sm:$0x3] %vm522_vm2, %v518_v8  ;;  %v421_v3 = vmul.f32 %v1274_v63, %v1638_v0  ;;  %v1705_v7 = vsel %vm98_vm8, 1.0, %v1386_v50  ;;  %v1275_v8 = vld [vmem:[#allocation3 + $0x20] sm:$0xff] }
 0x1c3   :  { %1000 = vst.msk [vmem:[#allocation7 + $0x2] sm:$0x3] %vm522_vm2, %v997_v9  ;;  %v418_v9 = vmul.f32 %v1275_v8, %v1636_v62 }
 0x200   :  { %v433_v18 = vpop.permute.xlu1 %432 }
 0x201   :  { %v470_v19 = vmul.f32 %v433_v18, %v414_v13  ;;  %v471_v16 = vmul.f32 %v433_v18, %v415_v15  ;;  %v557_v23 = vmul.f32 %v1660_v17, %v433_v18 }
 0x203   :  { %487 = vst [vmem:[#allocation6 + $0x8] sm:$0xff] %v471_v16  ;;  %v525_v24 = vadd.f32 %v471_v16, %v470_v19  ;;  %486 = vst [vmem:[#allocation6] sm:$0xff] %v470_v19  ;;  %v565_v40 = vsel %vm138_vm0, %v557_v23, 0.0  ;;  %v1276_v19 = vld [vmem:[#allocation3 + $0x28] sm:$0xff] }
 0x204   :  { %v438_v30 = vpop.permute.xlu1 %437  ;;  %v419_v16 = vmul.f32 %v1276_v19, %v1638_v0 }
 0x205   :  { %v558_v32 = vmul.f32 %v1663_v20, %v438_v30  ;;  %526 = vadd.xlane.f32.xlu0 %v525_v24  ;;  %v472_v33 = vmul.f32 %v438_v30, %v416_v26  ;;  %v473_v34 = vmul.f32 %v438_v30, %v417_v29  ;;  %v896_v26 = vmul.f32 %v1277_v25, %v1640_v1 }
 0x206   :  { %v422_v29 = vmul.f32 %v1278_v28, %v1636_v62 }
 0x207   :  { %v566_v27 = vsel %vm138_vm0, %v558_v32, 0.0  ;;  %489 = vst [vmem:[#allocation6 + $0x18] sm:$0xff] %v473_v34  ;;  %v528_v41 = vadd.f32 %v473_v34, %v472_v33  ;;  %488 = vst [vmem:[#allocation6 + $0x10] sm:$0xff] %v472_v33 }
 0x208   :  { %v1679_v44 = vadd.f32 %v566_v27, %v565_v40  ;;  %v911_v45 = vpop.permute.xlu1 %910  ;;  %v898_v40 = vmul.f32 %v1281_v39, %v1640_v1  ;;  %v1282_v27 = vld [vmem:[#allocation3 + $0xb8] sm:$0xff] }
 0x209   :  { %529 = vadd.xlane.f32.xlu1 %v528_v41  ;;  %v948_v46 = vmul.f32 %v911_v45, %v892_v37  ;;  %v949_v47 = vmul.f32 %v911_v45, %v893_v43  ;;  %v1033_v49 = vmul.f32 %v1660_v17, %v911_v45  ;;  %v1280_v37 = vld [vmem:[#allocation3 + $0x48] sm:$0xff]  ;;  %v899_v41 = vmul.f32 %v1282_v27, %v1642_v2 }
 0x20a   :  { %v423_v38 = vmul.f32 %v1280_v37, %v1638_v0 }
 0x20b   :  { %965 = vst [vmem:[#allocation6 + $0x80] sm:$0xff] %v948_v46  ;;  %966 = vst [vmem:[#allocation6 + $0x88] sm:$0xff] %v949_v47  ;;  %v1001_v51 = vadd.f32 %v949_v47, %v948_v46  ;;  %v448_v57 = vpop.permute.xlu0 %447  ;;  %v1041_v14 = vsel %vm138_vm0, %v1033_v49, 0.0 }
 0x20c   :  { %v916_v56 = vpop.permute.xlu1 %915  ;;  %v476_v12 = vmul.f32 %v448_v57, %v420_v61  ;;  %v477_v13 = vmul.f32 %v448_v57, %v421_v3  ;;  %v560_v30 = vmul.f32 %v1686_v48, %v448_v57 }
 0x20d   :  { %v1034_v4 = vmul.f32 %v1663_v20, %v916_v56  ;;  %1002 = vadd.xlane.f32.xlu0 %v1001_v51  ;;  %v950_v5 = vmul.f32 %v916_v56, %v894_v53  ;;  %v951_v6 = vmul.f32 %v916_v56, %v895_v55  ;;  %v424_v53 = vmul.f32 %v1283_v52, %v1636_v62 }
 0x20e   :  { %492 = vst [vmem:[#allocation6 + $0x30] sm:$0xff] %v476_v12  ;;  %493 = vst [vmem:[#allocation6 + $0x38] sm:$0xff] %v477_v13  ;;  %v534_v24 = vadd.f32 %v477_v13, %v476_v12  ;;  %v425_v55 = vmul.f32 %v1284_v54, %v1638_v0  ;;  %v570_v56 = vsel %vm138_vm0, %v560_v30, 0.0 }
 0x20f   :  { %v1042_v15 = vsel %vm138_vm0, %v1034_v4, 0.0  ;;  %967 = vst [vmem:[#allocation6 + $0x90] sm:$0xff] %v950_v5  ;;  %968 = vst [vmem:[#allocation6 + $0x98] sm:$0xff] %v951_v6  ;;  %v1004_v18 = vadd.f32 %v951_v6, %v950_v5  ;;  %v1285_v5 = vld [vmem:[#allocation3 + $0xc0] sm:$0xff] }
 0x210   :  { %v1043_v22 = vadd.f32 %v1042_v15, %v1041_v14  ;;  %v443_v23 = vpop.permute.xlu1 %442  ;;  %v900_v6 = vmul.f32 %v1285_v5, %v1640_v1 }
 0x211   :  { %v559_v31 = vmul.f32 %v1694_v58, %v443_v23  ;;  %1005 = vadd.xlane.f32.xlu0 %v1004_v18  ;;  %v474_v32 = vmul.f32 %v443_v23, %v418_v9  ;;  %v475_v33 = vmul.f32 %v443_v23, %v419_v16  ;;  %v453_v34 = vpop.permute.xlu0 %452  ;;  %v1286_v16 = vld [vmem:[#allocation3 + $0x60] sm:$0xff] }
 0x212   :  { %v561_v43 = vmul.f32 %v1697_v59, %v453_v34  ;;  %v478_v46 = vmul.f32 %v453_v34, %v422_v29  ;;  %v479_v51 = vmul.f32 %v453_v34, %v423_v38  ;;  %v426_v23 = vmul.f32 %v1286_v16, %v1636_v62  ;;  %v1288_v34 = vld [vmem:[#allocation3 + $0x68] sm:$0xff] }
 0x213   :  { %v568_v42 = vsel %vm138_vm0, %v559_v31, 0.0  ;;  %490 = vst [vmem:[#allocation6 + $0x20] sm:$0xff] %v474_v32  ;;  %491 = vst [vmem:[#allocation6 + $0x28] sm:$0xff] %v475_v33  ;;  %v531_v45 = vadd.f32 %v475_v33, %v474_v32  ;;  %v1287_v33 = vld [vmem:[#allocation3 + $0xc8] sm:$0xff]  ;;  %v427_v35 = vmul.f32 %v1288_v34, %v1638_v0 }
 0x214   :  { %v569_v47 = vadd.f32 %v568_v42, %v1679_v44  ;;  %v921_v49 = vpop.permute.xlu1 %920  ;;  %494 = vst [vmem:[#allocation6 + $0x40] sm:$0xff] %v478_v46  ;;  %v572_v3 = vsel %vm138_vm0, %v561_v43, 0.0  ;;  %495 = vst [vmem:[#allocation6 + $0x48] sm:$0xff] %v479_v51  ;;  %v537_v4 = vadd.f32 %v479_v51, %v478_v46 }
 0x215   :  { %v1035_v57 = vmul.f32 %v1694_v58, %v921_v49  ;;  %532 = vadd.xlane.f32.xlu1 %v531_v45  ;;  %v952_v60 = vmul.f32 %v921_v49, %v896_v26  ;;  %v953_v61 = vmul.f32 %v921_v49, %v897_v36  ;;  %v458_v44 = vpop.permute.xlu0 %457 }
 0x216   :  { %v571_v63 = vadd.f32 %v570_v56, %v569_v47  ;;  %v562_v9 = vmul.f32 %v1705_v7, %v458_v44  ;;  %v480_v13 = vmul.f32 %v458_v44, %v424_v53  ;;  %v481_v19 = vmul.f32 %v458_v44, %v425_v55  ;;  %v1290_v53 = vld [vmem:[#allocation3 + $0xd0] sm:$0xff]  ;;  %v1291_v55 = vld [vmem:[#allocation3 + $0x78] sm:$0xff] }
 0x217   :  { %v1044_v8 = vsel %vm138_vm0, %v1035_v57, 0.0  ;;  %969 = vst [vmem:[#allocation6 + $0xa0] sm:$0xff] %v952_v60  ;;  %970 = vst [vmem:[#allocation6 + $0xa8] sm:$0xff] %v953_v61  ;;  %v1007_v12 = vadd.f32 %v953_v61, %v952_v60  ;;  %v902_v54 = vmul.f32 %v1290_v53, %v1640_v1  ;;  %v1292_v60 = vld [vmem:[#allocation3 + $0xd8] sm:$0xff] }
 0x218   :  { %v573_v14 = vadd.f32 %v572_v3, %v571_v63  ;;  %v1045_v15 = vadd.f32 %v1044_v8, %v1043_v22  ;;  %v926_v18 = vpop.permute.xlu1 %925  ;;  %v574_v25 = vsel %vm138_vm0, %v562_v9, 0.0  ;;  %496 = vst [vmem:[#allocation6 + $0x50] sm:$0xff] %v480_v13  ;;  %497 = vst [vmem:[#allocation6 + $0x58] sm:$0xff] %v481_v19  ;;  %v540_v32 = vadd.f32 %v481_v19, %v480_v13  ;;  %v1293_v13 = vld [vmem:[#allocation3 + $0xe0] sm:$0xff] }
 0x219   :  { %v1036_v26 = vmul.f32 %v1686_v48, %v926_v18  ;;  %535 = vadd.xlane.f32.xlu1 %v534_v24  ;;  %1008 = vadd.xlane.f32.xlu0 %v1007_v12  ;;  %v954_v28 = vmul.f32 %v926_v18, %v898_v40  ;;  %v955_v29 = vmul.f32 %v926_v18, %v899_v41  ;;  %v463_v31 = vpop.permute.xlu0 %462  ;;  %v1289_v41 = vld [vmem:[#allocation3 + $0x70] sm:$0xff] }
 0x21a   :  { %v575_v30 = vadd.f32 %v574_v25, %v573_v14  ;;  %v901_v22 = vmul.f32 %v1287_v33, %v1642_v2  ;;  %v563_v37 = vmul.f32 %v1711_v11, %v463_v31  ;;  %v482_v38 = vmul.f32 %v463_v31, %v426_v23 }
 0x21b   :  { %v1046_v36 = vsel %vm138_vm0, %v1036_v26, 0.0  ;;  %971 = vst [vmem:[#allocation6 + $0xb0] sm:$0xff] %v954_v28  ;;  %972 = vst [vmem:[#allocation6 + $0xb8] sm:$0xff] %v955_v29  ;;  %v1010_v24 = vadd.f32 %v955_v29, %v954_v28  ;;  %v483_v27 = vmul.f32 %v463_v31, %v427_v35  ;;  %v428_v42 = vmul.f32 %v1289_v41, %v1636_v62 }
 0x21c   :  { %v1047_v39 = vadd.f32 %v1046_v36, %v1045_v15  ;;  %v931_v40 = vpop.permute.xlu1 %930  ;;  %v576_v43 = vsel %vm138_vm0, %v563_v37, 0.0  ;;  %498 = vst [vmem:[#allocation6 + $0x60] sm:$0xff] %v482_v38  ;;  %v429_v62 = vmul.f32 %v1291_v55, %v1638_v0  ;;  %v903_v61 = vmul.f32 %v1292_v60, %v1642_v2  ;;  %v1294_v15 = vld [vmem:[#allocation3 + $0xe8] sm:$0xff] }
 0x21d   :  { %v1037_v45 = vmul.f32 %v1697_v59, %v931_v40  ;;  %538 = vadd.xlane.f32.xlu1 %v537_v4  ;;  %1011 = vadd.xlane.f32.xlu0 %v1010_v24  ;;  %v956_v46 = vmul.f32 %v931_v40, %v900_v6  ;;  %v957_v47 = vmul.f32 %v931_v40, %v901_v22  ;;  %v1747_v51 = vpop.permute.xlu0 %467 }
 0x21e   :  { %v1745_v49 = vadd.f32 %v576_v43, %v575_v30  ;;  %499 = vst [vmem:[#allocation6 + $0x68] sm:$0xff] %v483_v27  ;;  %v543_v52 = vadd.f32 %v483_v27, %v482_v38  ;;  %v484_v63 = vmul.f32 %v1747_v51, %v428_v42  ;;  %v485_v4 = vmul.f32 %v1747_v51, %v429_v62  ;;  %v1295_v30 = vld [vmem:[#allocation3 + $0xf0] sm:$0xff] }
 0x21f   :  { %v1048_v56 = vsel %vm138_vm0, %v1037_v45, 0.0  ;;  %973 = vst [vmem:[#allocation6 + $0xc0] sm:$0xff] %v956_v46  ;;  %974 = vst [vmem:[#allocation6 + $0xc8] sm:$0xff] %v957_v47  ;;  %v1013_v57 = vadd.f32 %v957_v47, %v956_v46  ;;  %v904_v14 = vmul.f32 %v1293_v13, %v1640_v1  ;;  %v905_v18 = vmul.f32 %v1294_v15, %v1642_v2 }
 0x220   :  { %v1049_v3 = vadd.f32 %v1048_v56, %v1047_v39  ;;  %v936_v44 = vpop.permute.xlu1 %935  ;;  %500 = vst [vmem:[#allocation6 + $0x70] sm:$0xff] %v484_v63  ;;  %501 = vst [vmem:[#allocation6 + $0x78] sm:$0xff] %v485_v4  ;;  %v546_v8 = vadd.f32 %v485_v4, %v484_v63  ;;  %v906_v31 = vmul.f32 %v1295_v30, %v1640_v1 }
 0x221   :  { %v1038_v5 = vmul.f32 %v1705_v7, %v936_v44  ;;  %541 = vadd.xlane.f32.xlu1 %v540_v32  ;;  %1014 = vadd.xlane.f32.xlu0 %v1013_v57  ;;  %v958_v6 = vmul.f32 %v936_v44, %v902_v54  ;;  %v959_v0 = vmul.f32 %v936_v44, %v903_v61  ;;  %v1296_v32 = vld [vmem:[#allocation3 + $0xf8] sm:$0xff] }
 0x222   :  { %v907_v33 = vmul.f32 %v1296_v32, %v1642_v2 }
 0x223   :  { %v1050_v9 = vsel %vm138_vm0, %v1038_v5, 0.0  ;;  %975 = vst [vmem:[#allocation6 + $0xd0] sm:$0xff] %v958_v6  ;;  %976 = vst [vmem:[#allocation6 + $0xd8] sm:$0xff] %v959_v0  ;;  %v1016_v12 = vadd.f32 %v959_v0, %v958_v6 }
 0x224   :  { %v1051_v19 = vadd.f32 %v1050_v9, %v1049_v3  ;;  %v941_v16 = vpop.permute.xlu1 %940 }
 0x225   :  { %v1039_v23 = vmul.f32 %v1711_v11, %v941_v16  ;;  %544 = vadd.xlane.f32.xlu1 %v543_v52  ;;  %1017 = vadd.xlane.f32.xlu0 %v1016_v12  ;;  %v960_v25 = vmul.f32 %v941_v16, %v904_v14  ;;  %v961_v26 = vmul.f32 %v941_v16, %v905_v18 }
 0x227   :  { %v1052_v28 = vsel %vm138_vm0, %v1039_v23, 0.0  ;;  %977 = vst [vmem:[#allocation6 + $0xe0] sm:$0xff] %v960_v25  ;;  %978 = vst [vmem:[#allocation6 + $0xe8] sm:$0xff] %v961_v26  ;;  %v1019_v29 = vadd.f32 %v961_v26, %v960_v25 }
 0x228   :  { %v1763_v22 = vadd.f32 %v1052_v28, %v1051_v19  ;;  %v946_v34 = vpop.permute.xlu1 %945 }
 0x229   :  { %547 = vadd.xlane.f32.xlu1 %v546_v8  ;;  %1020 = vadd.xlane.f32.xlu0 %v1019_v29  ;;  %v962_v35 = vmul.f32 %v946_v34, %v906_v31  ;;  %v963_v36 = vmul.f32 %v946_v34, %v907_v33 }
 0x22b   :  { %979 = vst [vmem:[#allocation6 + $0xf0] sm:$0xff] %v962_v35  ;;  %980 = vst [vmem:[#allocation6 + $0xf8] sm:$0xff] %v963_v36  ;;  %v1022_v37 = vadd.f32 %v963_v36, %v962_v35 }
 0x22d   :  { %1023 = vadd.xlane.f32.xlu0 %v1022_v37 }
 0x22e   :  { %1328 = shalt.err (!%p1325_p9)
}
 0x22f   :  { %s1390_s15 = smov 32   ;;  %s1391_s16 = smov 2  }
 0x230   :  { %1117 = dma.vmem_to_hbm [thread:$0]  %s1112_s13, 64, %s1837_s10, [#allocation8], %s1390_s15, %s1390_s15, %s1391_s16  }
 0x231   :  { %s1392_s19 = smov [#allocation6]  }
 0x232   :  { %s1099_s7 = sshll.u32 %s1392_s19, 4  ;;  %s1100_s7 = int_to_ptr.vmem [resolvable:$true] %s1099_s7 }
 0x233   :  { %s1337_s20 = scalar_lea.vmem %s1100_s7, 4096  ;;  %p1342_p11 = scmp.lt.s32.totalorder %s1100_s7, %s1100_s7 }
 0x234   :  { %p1338_p10 = scmp.ne.s32.totalorder %s1100_s7, %s1337_s20  ;;  %p1343_p12 = scmp.lt.s32.totalorder %s1337_s20, %s1337_s20 }
 0x236   :  { %p1344_p13 = por %p1343_p12, %p1342_p11 }
 0x238   :  { %p1345_p0 = pnand %p1344_p13, %p1338_p10 }
 0x23a   :  { %1348 = shalt.err (!%p1345_p0)
}
 0x23b   :  { %1105 = dma.vmem_to_hbm [thread:$0]  %s1100_s7, 4096, %s1836_s9, [#allocation5], %s1384_s22, %s1384_s22, %s1385_s23   ;;  %v90_v24 = vadd.s32 56, %v1555_v21  ;;  %vm615_vm11 = vcmask 1040384   ;;  %vm617_vm12 = vcmask 517120  }
 0x23c   :  { %s1393_s9 = smov [#allocation9]  }
 0x23d   :  { %vm100_vm10 = vcmp.eq.s32.totalorder %v90_v24, %v1651_v10  ;;  %s1123_s10 = sshll.u32 %s1393_s9, 4  ;;  %s1124_s10 = int_to_ptr.vmem [resolvable:$true] %s1123_s10 }
 0x23e   :  { %v1780_v27 = vsel %vm100_vm10, 1.0, %v1386_v50  ;;  %s1357_s22 = scalar_lea.vmem %s1124_s10, 64  ;;  %p1362_p2 = scmp.lt.s32.totalorder %s1124_s10, %s1124_s10 }
 0x23f   :  { %v564_v46 = vmul.f32 %v1780_v27, %v1747_v51  ;;  %v1040_v61 = vmul.f32 %v1780_v27, %v946_v34  ;;  %p1358_p1 = scmp.ne.s32.totalorder %s1124_s10, %s1357_s22  ;;  %p1363_p3 = scmp.lt.s32.totalorder %s1357_s22, %s1357_s22 }
 0x241   :  { %v578_v50 = vsel %vm138_vm0, %v564_v46, 0.0  ;;  %p1364_p4 = por %p1363_p3, %p1362_p2 }
 0x242   :  { %v579_v4 = vadd.f32 %v578_v50, %v1745_v49 }
 0x243   :  { %p1365_p5 = pnand %p1364_p4, %p1358_p1 }
 0x28e   :  { %v527_v1 = vpop.xlane.xlu0 %526 }
 0x28f   :  { %v549_v42 = vmul.f32 0.00390625, %v527_v1 }
 0x291   :  { %v586_v54 = vmul.f32 %v1660_v17, %v549_v42 }
 0x292   :  { %v530_v38 = vpop.xlane.xlu1 %529 }
 0x293   :  { %v550_v41 = vmul.f32 0.00390625, %v530_v38  ;;  %v594_v5 = vsel %vm138_vm0, %v586_v54, 0.0 }
 0x295   :  { %v587_v52 = vmul.f32 %v1663_v20, %v550_v41 }
 0x296   :  { %v1003_v2 = vpop.xlane.xlu0 %1002 }
 0x297   :  { %v1025_v10 = vmul.f32 0.00390625, %v1003_v2  ;;  %v595_v51 = vsel %vm138_vm0, %v587_v52, 0.0 }
 0x298   :  { %v596_v18 = vadd.f32 %v595_v51, %v594_v5 }
 0x299   :  { %v1062_v6 = vmul.f32 %v1660_v17, %v1025_v10 }
 0x29a   :  { %v1006_v39 = vpop.xlane.xlu0 %1005 }
 0x29b   :  { %v1026_v53 = vmul.f32 0.00390625, %v1006_v39  ;;  %v1070_v23 = vsel %vm138_vm0, %v1062_v6, 0.0 }
 0x29d   :  { %v1063_v63 = vmul.f32 %v1663_v20, %v1026_v53  ;;  %v1054_v20 = vsel %vm138_vm0, %v1040_v61, 0.0 }
 0x29e   :  { %v533_v40 = vpop.xlane.xlu1 %532  ;;  %v1055_v34 = vadd.f32 %v1054_v20, %v1763_v22 }
 0x29f   :  { %v551_v47 = vmul.f32 0.00390625, %v533_v40  ;;  %v1071_v19 = vsel %vm138_vm0, %v1063_v63, 0.0 }
 0x2a0   :  { %v1072_v35 = vadd.f32 %v1071_v19, %v1070_v23 }
 0x2a1   :  { %v588_v57 = vmul.f32 %v1694_v58, %v551_v47 }
 0x2a2   :  { %v536_v43 = vpop.xlane.xlu1 %535  ;;  %v1009_v45 = vpop.xlane.xlu0 %1008 }
 0x2a3   :  { %v552_v21 = vmul.f32 0.00390625, %v536_v43  ;;  %v1027_v55 = vmul.f32 0.00390625, %v1009_v45  ;;  %v597_v12 = vsel %vm138_vm0, %v588_v57, 0.0  ;;  %v1056_v45 = vrot.slane %v1055_v34, 4 }
 0x2a4   :  { %v598_v25 = vadd.f32 %v597_v12, %v596_v18 }
 0x2a5   :  { %v589_v3 = vmul.f32 %v1686_v48, %v552_v21  ;;  %v1064_v0 = vmul.f32 %v1694_v58, %v1027_v55  ;;  %v580_v58 = vrot.slane %v579_v4, 4  ;;  %v1057_v57 = vadd.f32 %v1056_v45, %v1055_v34 }
 0x2a6   :  { %v539_v62 = vpop.xlane.xlu1 %538  ;;  %v1012_v56 = vpop.xlane.xlu0 %1011 }
 0x2a7   :  { %v553_v60 = vmul.f32 0.00390625, %v539_v62  ;;  %v1028_v44 = vmul.f32 0.00390625, %v1012_v56  ;;  %v599_v49 = vsel %vm138_vm0, %v589_v3, 0.0  ;;  %v1073_v26 = vsel %vm138_vm0, %v1064_v0, 0.0 }
 0x2a8   :  { %v581_v24 = vadd.f32 %v580_v58, %v579_v4  ;;  %v1074_v38 = vadd.f32 %v1073_v26, %v1072_v35 }
 0x2a9   :  { %v590_v13 = vmul.f32 %v1697_v59, %v553_v60  ;;  %v1065_v16 = vmul.f32 %v1686_v48, %v1028_v44  ;;  %v600_v48 = vadd.f32 %v599_v49, %v598_v25 }
 0x2aa   :  { %v542_v8 = vpop.xlane.xlu1 %541  ;;  %v1015_v9 = vpop.xlane.xlu0 %1014  ;;  %v582_v55 = vrot.slane %v581_v24, 2 }
 0x2ab   :  { %v554_v14 = vmul.f32 0.00390625, %v542_v8  ;;  %v1029_v15 = vmul.f32 0.00390625, %v1015_v9  ;;  %v601_v30 = vsel %vm138_vm0, %v590_v13, 0.0  ;;  %v1075_v36 = vsel %vm138_vm0, %v1065_v16, 0.0 }
 0x2ac   :  { %v602_v39 = vadd.f32 %v601_v30, %v600_v48  ;;  %v1076_v46 = vadd.f32 %v1075_v36, %v1074_v38  ;;  %v583_v44 = vadd.f32 %v582_v55, %v581_v24 }
 0x2ad   :  { %v591_v17 = vmul.f32 %v1705_v7, %v554_v14  ;;  %v1066_v31 = vmul.f32 %v1697_v59, %v1029_v15 }
 0x2ae   :  { %v545_v28 = vpop.xlane.xlu1 %544  ;;  %v1018_v29 = vpop.xlane.xlu0 %1017  ;;  %v584_v9 = vrot.slane %v583_v44, 1 }
 0x2af   :  { %v555_v32 = vmul.f32 0.00390625, %v545_v28  ;;  %v1030_v33 = vmul.f32 0.00390625, %v1018_v29  ;;  %v603_v37 = vsel %vm138_vm0, %v591_v17, 0.0  ;;  %v1077_v59 = vsel %vm138_vm0, %v1066_v31, 0.0 }
 0x2b0   :  { %v604_v47 = vadd.f32 %v603_v37, %v602_v39  ;;  %v1078_v21 = vadd.f32 %v1077_v59, %v1076_v46  ;;  %v585_v18 = vadd.f32 %v584_v9, %v583_v44 }
 0x2b1   :  { %v592_v1 = vmul.f32 %v1711_v11, %v555_v32  ;;  %v1067_v2 = vmul.f32 %v1705_v7, %v1030_v33 }
 0x2b2   :  { %v548_v40 = vpop.xlane.xlu1 %547  ;;  %v1021_v41 = vpop.xlane.xlu0 %1020 }
 0x2b3   :  { %v605_v42 = vsel %vm138_vm0, %v592_v1, 0.0  ;;  %v556_v22 = vmul.f32 0.00390625, %v548_v40  ;;  %v1031_v43 = vmul.f32 0.00390625, %v1021_v41  ;;  %v1079_v52 = vsel %vm138_vm0, %v1067_v2, 0.0 }
 0x2b4   :  { %v606_v54 = vadd.f32 %v605_v42, %v604_v47  ;;  %v1080_v60 = vadd.f32 %v1079_v52, %v1078_v21 }
 0x2b5   :  { %v593_v53 = vmul.f32 %v1780_v27, %v556_v22  ;;  %v1068_v7 = vmul.f32 %v1711_v11, %v1031_v43  ;;  %v1058_v11 = vrot.slane %v1057_v57, 2 }
 0x2b6   :  { %v1024_v10 = vpop.xlane.xlu0 %1023 }
 0x2b7   :  { %v607_v62 = vsel %vm138_vm0, %v593_v53, 0.0  ;;  %v1081_v56 = vsel %vm138_vm0, %v1068_v7, 0.0  ;;  %v1032_v50 = vmul.f32 0.00390625, %v1024_v10  ;;  %v1059_v12 = vadd.f32 %v1058_v11, %v1057_v57 }
 0x2b8   :  { %v608_v61 = vadd.f32 %v607_v62, %v606_v54  ;;  %v1082_v3 = vadd.f32 %v1081_v56, %v1080_v60 }
 0x2b9   :  { %v1069_v51 = vmul.f32 %v1780_v27, %v1032_v50  ;;  %v1060_v19 = vrot.slane %v1059_v12, 1 }
 0x2ba   :  { %v609_v63 = vrot.slane %v608_v61, 4 }
 0x2bb   :  { %v1083_v4 = vsel %vm138_vm0, %v1069_v51, 0.0  ;;  %v1061_v58 = vadd.f32 %v1060_v19, %v1059_v12 }
 0x2bc   :  { %v610_v5 = vadd.f32 %v609_v63, %v608_v61  ;;  %v1084_v6 = vadd.f32 %v1083_v4, %v1082_v3 }
 0x2be   :  { %v611_v0 = vrot.slane %v610_v5, 2  ;;  %v1085_v8 = vrot.slane %v1084_v6, 4 }
 0x2c0   :  { %v612_v13 = vadd.f32 %v611_v0, %v610_v5  ;;  %v1086_v14 = vadd.f32 %v1085_v8, %v1084_v6 }
 0x2c2   :  { %v613_v15 = vrot.slane %v612_v13, 1  ;;  %v1087_v20 = vrot.slane %v1086_v14, 2 }
 0x2c4   :  { %v614_v27 = vadd.f32 %v613_v15, %v612_v13  ;;  %v1088_v49 = vadd.f32 %v1087_v20, %v1086_v14 }
 0x2c6   :  { %v1089_v16 = vrot.slane %v1088_v49, 1  ;;  %v616_v17 = vsel %vm615_vm11, %v585_v18, %v614_v27 }
 0x2c7   :  { %618 = vst.msk [vmem:[#allocation9] sm:$0x3] %vm617_vm12, %v616_v17 }
 0x2c8   :  { %v1090_v23 = vadd.f32 %v1089_v16, %v1088_v49 }
 0x2ca   :  { %v1091_v25 = vsel %vm615_vm11, %v1061_v58, %v1090_v23 }
 0x2cb   :  { %1093 = vst.msk [vmem:[#allocation9 + $0x2] sm:$0x3] %vm617_vm12, %v1091_v25 }
 0x2cc   :  { %1368 = shalt.err (!%p1365_p5)
}
 0x2cd   :  { %1129 = dma.vmem_to_hbm [thread:$0]  %s1124_s10, 64, %s1838_s11, [#allocation8], %s1390_s15, %s1390_s15, %s1391_s16  }
 0x2ce   :  { %1379 = dma.done.wait [#allocation5], 4096  }
 0x2cf   :  { %1380 = vsyncadd [#allocation5], 4294963200 }
 0x2d0   :  { %1381 = dma.done.wait [#allocation8], 128  }
 0x2d1   :  { %1382 = vsyncadd [#allocation8], 4294967168 }
 0x2d2   :  { %1139 = vsyncpa [#allocation4], 1 }
 0x2d3   :  { %1140 = vsyncpa [#allocation5], 1 }
 0x2d4   :  { %1141 = vsyncpa [#allocation8], 1 }

</bundles_post_ra>
